<compile_context>
chip_gen: v6e
topology: v6e:2x2x1
jax: 0.10.0
libtpu: 0.0.40
codegen_flags: <defaults>
</compile_context>

<pallas_src>
import jax
import jax.numpy as jnp
from jax.experimental import pallas as pl
from jax.experimental.pallas import tpu as pltpu


def bilstm_attention_kernel(emb_ref, emb_rev_ref,
                            wx_f_ref, wx_b_ref, b_gates_ref, whh_bd_ref,
                            attn_in_t_ref, w_mix_t_ref, w_q_t_ref,
                            cls_w_pad_ref, cls_b_pad_ref,
                            logits_ref,
                            out_sc):
    """One batch tile of: fused BiLSTM -> 'general' self-attn -> sum -> ReLU -> linear."""
    emb = emb_ref[...]            # (Bt, S, E)
    emb_rev = emb_rev_ref[...]    # (Bt, S, E) time-reversed (feeds the backward direction)
    Bt, S, _ = emb.shape
    H = out_sc.shape[-1]          # BiLSTM feature width = 2 * per-direction hidden
    half = H // 2

    # x-contribution of every gate / timestep / both directions, time-aligned:
    #   fwd columns use emb[:, t], bwd columns use emb[:, S-1-t] (via emb_rev).
    # Gate lane layout: [i_f,i_b | f_f,f_b | g_f,g_b | o_f,o_b], width 4H.
    xg = (jnp.einsum('bse,eg->bsg', emb, wx_f_ref[...],
                     preferred_element_type=jnp.float32)
          + jnp.einsum('bse,eg->bsg', emb_rev, wx_b_ref[...],
                       preferred_element_type=jnp.float32)
          + b_gates_ref[...])                                   # (Bt, S, 4H)

    whh_bd = whh_bd_ref[...]      # (H, 4H) block-diag recurrent weights, pre-transposed

    h = jnp.zeros((Bt, H), jnp.float32)   # [h_fwd | h_bwd]
    c = jnp.zeros((Bt, H), jnp.float32)
    # S is small & static -> unrolled.
    # TODO(synk): for large S switch to lax.fori_loop to bound vreg live ranges.
    for t in range(S):
        gates = xg[:, t, :] + jnp.dot(h, whh_bd,
                                      preferred_element_type=jnp.float32)   # (Bt, 4H)
        i_g = jax.nn.sigmoid(gates[:, 0 * H:1 * H])
        f_g = jax.nn.sigmoid(gates[:, 1 * H:2 * H])
        g_g = jnp.tanh(gates[:, 2 * H:3 * H])
        o_g = jax.nn.sigmoid(gates[:, 3 * H:4 * H])
        c = f_g * c + i_g * g_g
        h = o_g * jnp.tanh(c)
        # forward output at time t, backward output at time S-1-t (PyTorch layout)
        out_sc[:, t, 0:half] = h[:, 0:half]
        out_sc[:, S - 1 - t, half:H] = h[:, half:H]

    out = out_sc[...]             # (Bt, S, H) BiLSTM features, [fwd | bwd] concat

    # TODO(synk): nn.Dropout is identity at inference time; modeled as a no-op.

    # torchnlp-style 'general' self-attention (query == context == out); weights pre-transposed.
    q = jnp.einsum('bsd,de->bse', out, attn_in_t_ref[...],
                   preferred_element_type=jnp.float32)                    # (Bt, S, H)
    scores = jnp.einsum('bqd,bkd->bqk', q, out,
                        preferred_element_type=jnp.float32)               # (Bt, S, S)
    scores = scores - jnp.max(scores, axis=-1, keepdims=True)
    p = jnp.exp(scores)
    w = p * pl.reciprocal(jnp.sum(p, axis=-1, keepdims=True), approx=True)
    mix = jnp.einsum('bqk,bkd->bqd', w, out,
                     preferred_element_type=jnp.float32)                  # (Bt, S, H)
    # linear_out([mix, q]) split into two (H,H) matmuls -> no lane-axis concatenate.
    attn_out = jnp.tanh(
        jnp.einsum('bsd,de->bse', mix, w_mix_t_ref[...],
                   preferred_element_type=jnp.float32)
        + jnp.einsum('bsd,de->bse', q, w_q_t_ref[...],
                     preferred_element_type=jnp.float32))                 # (Bt, S, H)

    features = jnp.maximum(jnp.sum(attn_out, axis=1), 0.0)                # (Bt, H)

    # classifier padded to 128 output lanes -> lane-dense store; real logits are [:, :2].
    logits_ref[...] = (jnp.dot(features, cls_w_pad_ref[...],
                               preferred_element_type=jnp.float32)
                       + cls_b_pad_ref[...])


def _pack_lstm_weights(w_ih_f, w_hh_f, b_f, w_ih_b, w_hh_b, b_b):
    """Pack bidirectional LSTM weights into the fused-kernel layout.

    Gate lane layout (width 4H = 8*half): [i_f,i_b | f_f,f_b | g_f,g_b | o_f,o_b].
    Returns:
      wx_f  (E, 4H): w_ih_f^T in the fwd gate columns, zeros elsewhere
      wx_b  (E, 4H): w_ih_b^T in the bwd gate columns, zeros elsewhere
      whh   (H, 4H): block-diagonal recurrent weights, rows = [h_fwd | h_bwd]
      bias  (1, 4H): summed (b_ih + b_hh) biases in the same column layout
    """
    four_half, E = w_ih_f.shape
    half = four_half // 4
    H = 2 * half
    G = 4 * H
    wx_f = jnp.zeros((E, G), jnp.float32)
    wx_b = jnp.zeros((E, G), jnp.float32)
    whh = jnp.zeros((H, G), jnp.float32)
    bias = jnp.zeros((1, G), jnp.float32)
    for g in range(4):
        rows = slice(g * half, (g + 1) * half)
        fcol = slice(g * H, g * H + half)
        bcol = slice(g * H + half, (g + 1) * H)
        wx_f = wx_f.at[:, fcol].set(w_ih_f[rows, :].T)
        wx_b = wx_b.at[:, bcol].set(w_ih_b[rows, :].T)
        whh = whh.at[:half, fcol].set(w_hh_f[rows, :].T)
        whh = whh.at[half:, bcol].set(w_hh_b[rows, :].T)
        bias = bias.at[:, fcol].set(b_f[:, rows])
        bias = bias.at[:, bcol].set(b_b[:, rows])
    return wx_f, wx_b, whh, bias


def bilstm_attention_forward(input_ids, params, labels=None):
    # Embedding gather stays in plain JAX glue.
    # TODO(synk): at production embed dims, fold this gather into the kernel via
    # PrefetchScalarGridSpec scalar-prefetch of input_ids + an Element row-gather index_map.
    emb = params['embedding'][input_ids].astype(jnp.float32)   # (B, S, E)
    emb_rev = emb[:, ::-1, :]                                  # time-reversed for the bwd LSTM
    B, S, E = emb.shape
    half = params['w_hh_f'].shape[1]
    H = 2 * half

    wx_f, wx_b, whh_bd, b_gates = _pack_lstm_weights(
        params['w_ih_f'], params['w_hh_f'], params['b_f'],
        params['w_ih_b'], params['w_hh_b'], params['b_b'])

    # Attention / classifier weights: pre-transpose in the wrapper (no in-kernel .T),
    # split linear_out into its mix / query halves, pad the classifier to 128 lanes.
    attn_in_t = params['attn_in_w'].T                           # (H, H)
    w_mix_t = params['attn_out_w'][:, :H].T                     # (H, H)
    w_q_t = params['attn_out_w'][:, H:].T                       # (H, H)
    out_pad = 128
    cls_w_pad = jnp.zeros((H, out_pad), jnp.float32).at[:, :2].set(params['cls_w'].T)
    cls_b_pad = jnp.zeros((1, out_pad), jnp.float32).at[:, :2].set(params['cls_b'])

    # Batch tile: whole batch at small sizes; multiple-of-8 tiles for big batches so the
    # parallel grid can use both TensorCores on v7x and pipeline emb DMA.  (Per-generation
    # tuning would pick larger tiles on v5e/v6e's 128 MiB VMEM and set vmem_limit_bytes.)
    B_t = B
    for cand in (64, 32, 16, 8):
        if B > cand and B % cand == 0:
            B_t = cand
            break
    grid = (B // B_t,)

    emb_spec = pl.BlockSpec((B_t, S, E), lambda i: (i, 0, 0))

    def full_spec(x):
        nd = x.ndim
        return pl.BlockSpec(x.shape, lambda i: (0,) * nd)

    weight_args = (wx_f, wx_b, b_gates, whh_bd, attn_in_t, w_mix_t, w_q_t,
                   cls_w_pad, cls_b_pad)

    logits_pad = pl.pallas_call(
        bilstm_attention_kernel,
        out_shape=jax.ShapeDtypeStruct((B, out_pad), jnp.float32),
        grid_spec=pltpu.PrefetchScalarGridSpec(
            num_scalar_prefetch=0,
            grid=grid,
            in_specs=[emb_spec, emb_spec] + [full_spec(w) for w in weight_args],
            out_specs=pl.BlockSpec((B_t, out_pad), lambda i: (i, 0)),
            scratch_shapes=[pltpu.VMEM((B_t, S, H), jnp.float32)],
        ),
        compiler_params=pltpu.CompilerParams(
            dimension_semantics=("parallel",),
        ),
    )(emb, emb_rev, *weight_args)

    logits = logits_pad[:, :2]

    outputs = {'logits': logits}
    if labels is not None:
        # CrossEntropyLoss (mean reduction) in plain JAX glue.
        logz = jax.nn.logsumexp(logits, axis=-1)
        picked = jnp.take_along_axis(logits, labels[:, None], axis=-1)[:, 0]
        outputs['loss'] = jnp.mean(logz - picked)
    return outputs


def init_params(key, vocab_size, embed_dim, hidden_dim):
    half = hidden_dim // 2
    ks = jax.random.split(key, 12)
    s = 0.1
    return {
        'embedding':  jax.random.normal(ks[0], (vocab_size, embed_dim), jnp.float32) * s,
        # forward-direction LSTM (PyTorch gate order i, f, g, o)
        'w_ih_f': jax.random.normal(ks[1], (4 * half, embed_dim), jnp.float32) * s,
        'w_hh_f': jax.random.normal(ks[2], (4 * half, half), jnp.float32) * s,
        'b_f':    jax.random.normal(ks[3], (1, 4 * half), jnp.float32) * s,  # b_ih + b_hh
        # backward-direction LSTM
        'w_ih_b': jax.random.normal(ks[4], (4 * half, embed_dim), jnp.float32) * s,
        'w_hh_b': jax.random.normal(ks[5], (4 * half, half), jnp.float32) * s,
        'b_b':    jax.random.normal(ks[6], (1, 4 * half), jnp.float32) * s,
        # Attention(dimensions=hidden_dim): linear_in (H,H), linear_out (H,2H), no bias
        'attn_in_w':  jax.random.normal(ks[7], (hidden_dim, hidden_dim), jnp.float32) * s,
        'attn_out_w': jax.random.normal(ks[8], (hidden_dim, 2 * hidden_dim), jnp.float32) * s,
        # classifier Linear(hidden_dim, 2)
        'cls_w': jax.random.normal(ks[9], (2, hidden_dim), jnp.float32) * s,
        'cls_b': jax.random.normal(ks[10], (1, 2), jnp.float32) * s,
    }


if __name__ == "__main__":
    VOCAB, EMBED_DIM, HIDDEN_DIM = 50, 16, 32
    BATCH, SEQ = 2, 8

    key = jax.random.PRNGKey(0)
    kp, ki, kl = jax.random.split(key, 3)
    params = init_params(kp, VOCAB, EMBED_DIM, HIDDEN_DIM)
    input_ids = jax.random.randint(ki, (BATCH, SEQ), 0, VOCAB, dtype=jnp.int32)
    labels = jax.random.randint(kl, (BATCH,), 0, 2, dtype=jnp.int32)

    outputs = bilstm_attention_forward(input_ids, params, labels=labels)
    jax.block_until_ready(outputs['logits'])
    jax.block_until_ready(outputs['loss'])
    assert outputs['logits'].shape == (BATCH, 2)
    print("KERNEL_OK")
</pallas_src>

<mosaic_0001>
module attributes {stable_mosaic.version = 11 : i64} {
  func.func @bilstm_attention_kernel(%arg0: i32, %arg1: memref<2x8x16xf32, #tpu.memory_space<vmem>>, %arg2: memref<2x8x16xf32, #tpu.memory_space<vmem>>, %arg3: memref<16x128xf32, #tpu.memory_space<vmem>>, %arg4: memref<16x128xf32, #tpu.memory_space<vmem>>, %arg5: memref<1x128xf32, #tpu.memory_space<vmem>>, %arg6: memref<32x128xf32, #tpu.memory_space<vmem>>, %arg7: memref<32x32xf32, #tpu.memory_space<vmem>>, %arg8: memref<32x32xf32, #tpu.memory_space<vmem>>, %arg9: memref<32x32xf32, #tpu.memory_space<vmem>>, %arg10: memref<32x128xf32, #tpu.memory_space<vmem>>, %arg11: memref<1x128xf32, #tpu.memory_space<vmem>>, %arg12: memref<2x128xf32, #tpu.memory_space<vmem>>, %arg13: memref<2x8x32xf32, #tpu.memory_space<vmem>>) attributes {dimension_semantics = [#tpu.dimension_semantics<parallel>], iteration_bounds = array<i64: 1>, scalar_prefetch = 0 : i64, scratch_operands = 1 : i64, tpu.core_type = #tpu.core_type<tc>, window_params = [{transform_indices = @transform_0, window_bounds = array<i64: 2, 8, 16>}, {transform_indices = @transform_1, window_bounds = array<i64: 2, 8, 16>}, {pipeline_mode = #tpu.pipeline_mode<synchronous>, transform_indices = @transform_2, window_bounds = array<i64: 16, 128>}, {pipeline_mode = #tpu.pipeline_mode<synchronous>, transform_indices = @transform_3, window_bounds = array<i64: 16, 128>}, {pipeline_mode = #tpu.pipeline_mode<synchronous>, transform_indices = @transform_4, window_bounds = array<i64: 1, 128>}, {pipeline_mode = #tpu.pipeline_mode<synchronous>, transform_indices = @transform_5, window_bounds = array<i64: 32, 128>}, {pipeline_mode = #tpu.pipeline_mode<synchronous>, transform_indices = @transform_6, window_bounds = array<i64: 32, 32>}, {pipeline_mode = #tpu.pipeline_mode<synchronous>, transform_indices = @transform_7, window_bounds = array<i64: 32, 32>}, {pipeline_mode = #tpu.pipeline_mode<synchronous>, transform_indices = @transform_8, window_bounds = array<i64: 32, 32>}, {pipeline_mode = #tpu.pipeline_mode<synchronous>, transform_indices = @transform_9, window_bounds = array<i64: 32, 128>}, {pipeline_mode = #tpu.pipeline_mode<synchronous>, transform_indices = @transform_10, window_bounds = array<i64: 1, 128>}, {transform_indices = @transform_11, window_bounds = array<i64: 2, 128>}]} {
    %c0 = arith.constant 0 : index
    %c0_0 = arith.constant 0 : index
    %c0_1 = arith.constant 0 : index
    %0 = vector.load %arg1[%c0, %c0_0, %c0_1] : memref<2x8x16xf32, #tpu.memory_space<vmem>>, vector<2x8x16xf32>
    %c0_2 = arith.constant 0 : index
    %c0_3 = arith.constant 0 : index
    %c0_4 = arith.constant 0 : index
    %1 = vector.load %arg2[%c0_2, %c0_3, %c0_4] : memref<2x8x16xf32, #tpu.memory_space<vmem>>, vector<2x8x16xf32>
    %c0_5 = arith.constant 0 : index
    %c0_6 = arith.constant 0 : index
    %2 = vector.load %arg3[%c0_5, %c0_6] : memref<16x128xf32, #tpu.memory_space<vmem>>, vector<16x128xf32>
    "tpu.trace_start"() <{level = 10 : i32, message = "bse,eg->bsg"}> : () -> ()
    %cst = arith.constant dense<0.000000e+00> : vector<2x8x128xf32>
    %3 = tpu.matmul %0, %2, %cst {dimension_numbers = #tpu.dot_dimension_numbers<[2], [0], [0, 1], [1], [0, 0, 0, 1, 1, 1], [], []>} : vector<2x8x16xf32>, vector<16x128xf32>, vector<2x8x128xf32> -> vector<2x8x128xf32>
    "tpu.trace_stop"() : () -> ()
    %c0_7 = arith.constant 0 : index
    %c0_8 = arith.constant 0 : index
    %4 = vector.load %arg4[%c0_7, %c0_8] : memref<16x128xf32, #tpu.memory_space<vmem>>, vector<16x128xf32>
    "tpu.trace_start"() <{level = 10 : i32, message = "bse,eg->bsg"}> : () -> ()
    %cst_9 = arith.constant dense<0.000000e+00> : vector<2x8x128xf32>
    %5 = tpu.matmul %1, %4, %cst_9 {dimension_numbers = #tpu.dot_dimension_numbers<[2], [0], [0, 1], [1], [0, 0, 0, 1, 1, 1], [], []>} : vector<2x8x16xf32>, vector<16x128xf32>, vector<2x8x128xf32> -> vector<2x8x128xf32>
    "tpu.trace_stop"() : () -> ()
    %6 = arith.addf %3, %5 : vector<2x8x128xf32>
    %c0_10 = arith.constant 0 : index
    %c0_11 = arith.constant 0 : index
    %7 = vector.load %arg5[%c0_10, %c0_11] : memref<1x128xf32, #tpu.memory_space<vmem>>, vector<1x128xf32>
    %8 = vector.shape_cast %7 : vector<1x128xf32> to vector<1x1x128xf32>
    %9 = vector.broadcast %8 : vector<1x1x128xf32> to vector<2x8x128xf32>
    %10 = arith.addf %6, %9 : vector<2x8x128xf32>
    %c0_12 = arith.constant 0 : index
    %c0_13 = arith.constant 0 : index
    %11 = vector.load %arg6[%c0_12, %c0_13] : memref<32x128xf32, #tpu.memory_space<vmem>>, vector<32x128xf32>
    %cst_14 = arith.constant 0.000000e+00 : f32
    %12 = vector.broadcast %cst_14 : f32 to vector<2x32xf32>
    %cst_15 = arith.constant 0.000000e+00 : f32
    %13 = vector.broadcast %cst_15 : f32 to vector<2x32xf32>
    %14 = vector.extract_strided_slice %10 {offsets = [0, 0, 0], sizes = [2, 1, 128], strides = [1, 1, 1]} : vector<2x8x128xf32> to vector<2x1x128xf32>
    %15 = vector.shape_cast %14 : vector<2x1x128xf32> to vector<2x128xf32>
    %cst_16 = arith.constant dense<0.000000e+00> : vector<2x128xf32>
    %16 = tpu.matmul %12, %11, %cst_16 {dimension_numbers = #tpu.dot_dimension_numbers<[1], [0], [0], [1], [0, 0, 1, 1], [], []>} : vector<2x32xf32>, vector<32x128xf32>, vector<2x128xf32> -> vector<2x128xf32>
    %17 = arith.addf %15, %16 : vector<2x128xf32>
    %18 = vector.extract_strided_slice %17 {offsets = [0, 0], sizes = [2, 32], strides = [1, 1]} : vector<2x128xf32> to vector<2x32xf32>
    %19 = arith.negf %18 : vector<2x32xf32>
    %20 = math.exp %19 : vector<2x32xf32>
    %cst_17 = arith.constant 1.000000e+00 : f32
    %21 = vector.broadcast %cst_17 : f32 to vector<2x32xf32>
    %22 = arith.addf %21, %20 : vector<2x32xf32>
    %23 = arith.divf %21, %22 : vector<2x32xf32>
    %24 = vector.extract_strided_slice %17 {offsets = [0, 32], sizes = [2, 32], strides = [1, 1]} : vector<2x128xf32> to vector<2x32xf32>
    %25 = arith.negf %24 : vector<2x32xf32>
    %26 = math.exp %25 : vector<2x32xf32>
    %cst_18 = arith.constant 1.000000e+00 : f32
    %27 = vector.broadcast %cst_18 : f32 to vector<2x32xf32>
    %28 = arith.addf %27, %26 : vector<2x32xf32>
    %29 = arith.divf %27, %28 : vector<2x32xf32>
    %30 = vector.extract_strided_slice %17 {offsets = [0, 64], sizes = [2, 32], strides = [1, 1]} : vector<2x128xf32> to vector<2x32xf32>
    %31 = math.tanh %30 : vector<2x32xf32>
    %32 = vector.extract_strided_slice %17 {offsets = [0, 96], sizes = [2, 32], strides = [1, 1]} : vector<2x128xf32> to vector<2x32xf32>
    %33 = arith.negf %32 : vector<2x32xf32>
    %34 = math.exp %33 : vector<2x32xf32>
    %cst_19 = arith.constant 1.000000e+00 : f32
    %35 = vector.broadcast %cst_19 : f32 to vector<2x32xf32>
    %36 = arith.addf %35, %34 : vector<2x32xf32>
    %37 = arith.divf %35, %36 : vector<2x32xf32>
    %38 = arith.mulf %29, %13 : vector<2x32xf32>
    %39 = arith.mulf %23, %31 : vector<2x32xf32>
    %40 = arith.addf %38, %39 : vector<2x32xf32>
    %41 = math.tanh %40 : vector<2x32xf32>
    %42 = arith.mulf %37, %41 : vector<2x32xf32>
    %43 = vector.extract_strided_slice %42 {offsets = [0, 0], sizes = [2, 16], strides = [1, 1]} : vector<2x32xf32> to vector<2x16xf32>
    %c0_20 = arith.constant 0 : index
    %c0_21 = arith.constant 0 : index
    %c0_22 = arith.constant 0 : index
    %44 = vector.load %arg13[%c0_20, %c0_21, %c0_22] : memref<2x8x32xf32, #tpu.memory_space<vmem>>, vector<2x1x16xf32>
    %45 = vector.shape_cast %44 : vector<2x1x16xf32> to vector<2x16xf32>
    %46 = vector.shape_cast %43 : vector<2x16xf32> to vector<2x1x16xf32>
    tpu.vector_store %arg13[%c0_20, %c0_21, %c0_22], %46 {strides = array<i32>} : memref<2x8x32xf32, #tpu.memory_space<vmem>>, vector<2x1x16xf32>,
    %47 = vector.extract_strided_slice %42 {offsets = [0, 16], sizes = [2, 16], strides = [1, 1]} : vector<2x32xf32> to vector<2x16xf32>
    %c0_23 = arith.constant 0 : index
    %c7 = arith.constant 7 : index
    %c16 = arith.constant 16 : index
    %48 = vector.load %arg13[%c0_23, %c7, %c16] : memref<2x8x32xf32, #tpu.memory_space<vmem>>, vector<2x1x16xf32>
    %49 = vector.shape_cast %48 : vector<2x1x16xf32> to vector<2x16xf32>
    %50 = vector.shape_cast %47 : vector<2x16xf32> to vector<2x1x16xf32>
    tpu.vector_store %arg13[%c0_23, %c7, %c16], %50 {strides = array<i32>} : memref<2x8x32xf32, #tpu.memory_space<vmem>>, vector<2x1x16xf32>,
    %51 = vector.extract_strided_slice %10 {offsets = [0, 1, 0], sizes = [2, 1, 128], strides = [1, 1, 1]} : vector<2x8x128xf32> to vector<2x1x128xf32>
    %52 = vector.shape_cast %51 : vector<2x1x128xf32> to vector<2x128xf32>
    %cst_24 = arith.constant dense<0.000000e+00> : vector<2x128xf32>
    %53 = tpu.matmul %42, %11, %cst_24 {dimension_numbers = #tpu.dot_dimension_numbers<[1], [0], [0], [1], [0, 0, 1, 1], [], []>} : vector<2x32xf32>, vector<32x128xf32>, vector<2x128xf32> -> vector<2x128xf32>
    %54 = arith.addf %52, %53 : vector<2x128xf32>
    %55 = vector.extract_strided_slice %54 {offsets = [0, 0], sizes = [2, 32], strides = [1, 1]} : vector<2x128xf32> to vector<2x32xf32>
    %56 = arith.negf %55 : vector<2x32xf32>
    %57 = math.exp %56 : vector<2x32xf32>
    %cst_25 = arith.constant 1.000000e+00 : f32
    %58 = vector.broadcast %cst_25 : f32 to vector<2x32xf32>
    %59 = arith.addf %58, %57 : vector<2x32xf32>
    %60 = arith.divf %58, %59 : vector<2x32xf32>
    %61 = vector.extract_strided_slice %54 {offsets = [0, 32], sizes = [2, 32], strides = [1, 1]} : vector<2x128xf32> to vector<2x32xf32>
    %62 = arith.negf %61 : vector<2x32xf32>
    %63 = math.exp %62 : vector<2x32xf32>
    %cst_26 = arith.constant 1.000000e+00 : f32
    %64 = vector.broadcast %cst_26 : f32 to vector<2x32xf32>
    %65 = arith.addf %64, %63 : vector<2x32xf32>
    %66 = arith.divf %64, %65 : vector<2x32xf32>
    %67 = vector.extract_strided_slice %54 {offsets = [0, 64], sizes = [2, 32], strides = [1, 1]} : vector<2x128xf32> to vector<2x32xf32>
    %68 = math.tanh %67 : vector<2x32xf32>
    %69 = vector.extract_strided_slice %54 {offsets = [0, 96], sizes = [2, 32], strides = [1, 1]} : vector<2x128xf32> to vector<2x32xf32>
    %70 = arith.negf %69 : vector<2x32xf32>
    %71 = math.exp %70 : vector<2x32xf32>
    %cst_27 = arith.constant 1.000000e+00 : f32
    %72 = vector.broadcast %cst_27 : f32 to vector<2x32xf32>
    %73 = arith.addf %72, %71 : vector<2x32xf32>
    %74 = arith.divf %72, %73 : vector<2x32xf32>
    %75 = arith.mulf %66, %40 : vector<2x32xf32>
    %76 = arith.mulf %60, %68 : vector<2x32xf32>
    %77 = arith.addf %75, %76 : vector<2x32xf32>
    %78 = math.tanh %77 : vector<2x32xf32>
    %79 = arith.mulf %74, %78 : vector<2x32xf32>
    %80 = vector.extract_strided_slice %79 {offsets = [0, 0], sizes = [2, 16], strides = [1, 1]} : vector<2x32xf32> to vector<2x16xf32>
    %c0_28 = arith.constant 0 : index
    %c1 = arith.constant 1 : index
    %c0_29 = arith.constant 0 : index
    %81 = vector.load %arg13[%c0_28, %c1, %c0_29] : memref<2x8x32xf32, #tpu.memory_space<vmem>>, vector<2x1x16xf32>
    %82 = vector.shape_cast %81 : vector<2x1x16xf32> to vector<2x16xf32>
    %83 = vector.shape_cast %80 : vector<2x16xf32> to vector<2x1x16xf32>
    tpu.vector_store %arg13[%c0_28, %c1, %c0_29], %83 {strides = array<i32>} : memref<2x8x32xf32, #tpu.memory_space<vmem>>, vector<2x1x16xf32>,
    %84 = vector.extract_strided_slice %79 {offsets = [0, 16], sizes = [2, 16], strides = [1, 1]} : vector<2x32xf32> to vector<2x16xf32>
    %c0_30 = arith.constant 0 : index
    %c6 = arith.constant 6 : index
    %c16_31 = arith.constant 16 : index
    %85 = vector.load %arg13[%c0_30, %c6, %c16_31] : memref<2x8x32xf32, #tpu.memory_space<vmem>>, vector<2x1x16xf32>
    %86 = vector.shape_cast %85 : vector<2x1x16xf32> to vector<2x16xf32>
    %87 = vector.shape_cast %84 : vector<2x16xf32> to vector<2x1x16xf32>
    tpu.vector_store %arg13[%c0_30, %c6, %c16_31], %87 {strides = array<i32>} : memref<2x8x32xf32, #tpu.memory_space<vmem>>, vector<2x1x16xf32>,
    %88 = vector.extract_strided_slice %10 {offsets = [0, 2, 0], sizes = [2, 1, 128], strides = [1, 1, 1]} : vector<2x8x128xf32> to vector<2x1x128xf32>
    %89 = vector.shape_cast %88 : vector<2x1x128xf32> to vector<2x128xf32>
    %cst_32 = arith.constant dense<0.000000e+00> : vector<2x128xf32>
    %90 = tpu.matmul %79, %11, %cst_32 {dimension_numbers = #tpu.dot_dimension_numbers<[1], [0], [0], [1], [0, 0, 1, 1], [], []>} : vector<2x32xf32>, vector<32x128xf32>, vector<2x128xf32> -> vector<2x128xf32>
    %91 = arith.addf %89, %90 : vector<2x128xf32>
    %92 = vector.extract_strided_slice %91 {offsets = [0, 0], sizes = [2, 32], strides = [1, 1]} : vector<2x128xf32> to vector<2x32xf32>
    %93 = arith.negf %92 : vector<2x32xf32>
    %94 = math.exp %93 : vector<2x32xf32>
    %cst_33 = arith.constant 1.000000e+00 : f32
    %95 = vector.broadcast %cst_33 : f32 to vector<2x32xf32>
    %96 = arith.addf %95, %94 : vector<2x32xf32>
    %97 = arith.divf %95, %96 : vector<2x32xf32>
    %98 = vector.extract_strided_slice %91 {offsets = [0, 32], sizes = [2, 32], strides = [1, 1]} : vector<2x128xf32> to vector<2x32xf32>
    %99 = arith.negf %98 : vector<2x32xf32>
    %100 = math.exp %99 : vector<2x32xf32>
    %cst_34 = arith.constant 1.000000e+00 : f32
    %101 = vector.broadcast %cst_34 : f32 to vector<2x32xf32>
    %102 = arith.addf %101, %100 : vector<2x32xf32>
    %103 = arith.divf %101, %102 : vector<2x32xf32>
    %104 = vector.extract_strided_slice %91 {offsets = [0, 64], sizes = [2, 32], strides = [1, 1]} : vector<2x128xf32> to vector<2x32xf32>
    %105 = math.tanh %104 : vector<2x32xf32>
    %106 = vector.extract_strided_slice %91 {offsets = [0, 96], sizes = [2, 32], strides = [1, 1]} : vector<2x128xf32> to vector<2x32xf32>
    %107 = arith.negf %106 : vector<2x32xf32>
    %108 = math.exp %107 : vector<2x32xf32>
    %cst_35 = arith.constant 1.000000e+00 : f32
    %109 = vector.broadcast %cst_35 : f32 to vector<2x32xf32>
    %110 = arith.addf %109, %108 : vector<2x32xf32>
    %111 = arith.divf %109, %110 : vector<2x32xf32>
    %112 = arith.mulf %103, %77 : vector<2x32xf32>
    %113 = arith.mulf %97, %105 : vector<2x32xf32>
    %114 = arith.addf %112, %113 : vector<2x32xf32>
    %115 = math.tanh %114 : vector<2x32xf32>
    %116 = arith.mulf %111, %115 : vector<2x32xf32>
    %117 = vector.extract_strided_slice %116 {offsets = [0, 0], sizes = [2, 16], strides = [1, 1]} : vector<2x32xf32> to vector<2x16xf32>
    %c0_36 = arith.constant 0 : index
    %c2 = arith.constant 2 : index
    %c0_37 = arith.constant 0 : index
    %118 = vector.load %arg13[%c0_36, %c2, %c0_37] : memref<2x8x32xf32, #tpu.memory_space<vmem>>, vector<2x1x16xf32>
    %119 = vector.shape_cast %118 : vector<2x1x16xf32> to vector<2x16xf32>
    %120 = vector.shape_cast %117 : vector<2x16xf32> to vector<2x1x16xf32>
    tpu.vector_store %arg13[%c0_36, %c2, %c0_37], %120 {strides = array<i32>} : memref<2x8x32xf32, #tpu.memory_space<vmem>>, vector<2x1x16xf32>,
    %121 = vector.extract_strided_slice %116 {offsets = [0, 16], sizes = [2, 16], strides = [1, 1]} : vector<2x32xf32> to vector<2x16xf32>
    %c0_38 = arith.constant 0 : index
    %c5 = arith.constant 5 : index
    %c16_39 = arith.constant 16 : index
    %122 = vector.load %arg13[%c0_38, %c5, %c16_39] : memref<2x8x32xf32, #tpu.memory_space<vmem>>, vector<2x1x16xf32>
    %123 = vector.shape_cast %122 : vector<2x1x16xf32> to vector<2x16xf32>
    %124 = vector.shape_cast %121 : vector<2x16xf32> to vector<2x1x16xf32>
    tpu.vector_store %arg13[%c0_38, %c5, %c16_39], %124 {strides = array<i32>} : memref<2x8x32xf32, #tpu.memory_space<vmem>>, vector<2x1x16xf32>,
    %125 = vector.extract_strided_slice %10 {offsets = [0, 3, 0], sizes = [2, 1, 128], strides = [1, 1, 1]} : vector<2x8x128xf32> to vector<2x1x128xf32>
    %126 = vector.shape_cast %125 : vector<2x1x128xf32> to vector<2x128xf32>
    %cst_40 = arith.constant dense<0.000000e+00> : vector<2x128xf32>
    %127 = tpu.matmul %116, %11, %cst_40 {dimension_numbers = #tpu.dot_dimension_numbers<[1], [0], [0], [1], [0, 0, 1, 1], [], []>} : vector<2x32xf32>, vector<32x128xf32>, vector<2x128xf32> -> vector<2x128xf32>
    %128 = arith.addf %126, %127 : vector<2x128xf32>
    %129 = vector.extract_strided_slice %128 {offsets = [0, 0], sizes = [2, 32], strides = [1, 1]} : vector<2x128xf32> to vector<2x32xf32>
    %130 = arith.negf %129 : vector<2x32xf32>
    %131 = math.exp %130 : vector<2x32xf32>
    %cst_41 = arith.constant 1.000000e+00 : f32
    %132 = vector.broadcast %cst_41 : f32 to vector<2x32xf32>
    %133 = arith.addf %132, %131 : vector<2x32xf32>
    %134 = arith.divf %132, %133 : vector<2x32xf32>
    %135 = vector.extract_strided_slice %128 {offsets = [0, 32], sizes = [2, 32], strides = [1, 1]} : vector<2x128xf32> to vector<2x32xf32>
    %136 = arith.negf %135 : vector<2x32xf32>
    %137 = math.exp %136 : vector<2x32xf32>
    %cst_42 = arith.constant 1.000000e+00 : f32
    %138 = vector.broadcast %cst_42 : f32 to vector<2x32xf32>
    %139 = arith.addf %138, %137 : vector<2x32xf32>
    %140 = arith.divf %138, %139 : vector<2x32xf32>
    %141 = vector.extract_strided_slice %128 {offsets = [0, 64], sizes = [2, 32], strides = [1, 1]} : vector<2x128xf32> to vector<2x32xf32>
    %142 = math.tanh %141 : vector<2x32xf32>
    %143 = vector.extract_strided_slice %128 {offsets = [0, 96], sizes = [2, 32], strides = [1, 1]} : vector<2x128xf32> to vector<2x32xf32>
    %144 = arith.negf %143 : vector<2x32xf32>
    %145 = math.exp %144 : vector<2x32xf32>
    %cst_43 = arith.constant 1.000000e+00 : f32
    %146 = vector.broadcast %cst_43 : f32 to vector<2x32xf32>
    %147 = arith.addf %146, %145 : vector<2x32xf32>
    %148 = arith.divf %146, %147 : vector<2x32xf32>
    %149 = arith.mulf %140, %114 : vector<2x32xf32>
    %150 = arith.mulf %134, %142 : vector<2x32xf32>
    %151 = arith.addf %149, %150 : vector<2x32xf32>
    %152 = math.tanh %151 : vector<2x32xf32>
    %153 = arith.mulf %148, %152 : vector<2x32xf32>
    %154 = vector.extract_strided_slice %153 {offsets = [0, 0], sizes = [2, 16], strides = [1, 1]} : vector<2x32xf32> to vector<2x16xf32>
    %c0_44 = arith.constant 0 : index
    %c3 = arith.constant 3 : index
    %c0_45 = arith.constant 0 : index
    %155 = vector.load %arg13[%c0_44, %c3, %c0_45] : memref<2x8x32xf32, #tpu.memory_space<vmem>>, vector<2x1x16xf32>
    %156 = vector.shape_cast %155 : vector<2x1x16xf32> to vector<2x16xf32>
    %157 = vector.shape_cast %154 : vector<2x16xf32> to vector<2x1x16xf32>
    tpu.vector_store %arg13[%c0_44, %c3, %c0_45], %157 {strides = array<i32>} : memref<2x8x32xf32, #tpu.memory_space<vmem>>, vector<2x1x16xf32>,
    %158 = vector.extract_strided_slice %153 {offsets = [0, 16], sizes = [2, 16], strides = [1, 1]} : vector<2x32xf32> to vector<2x16xf32>
    %c0_46 = arith.constant 0 : index
    %c4 = arith.constant 4 : index
    %c16_47 = arith.constant 16 : index
    %159 = vector.load %arg13[%c0_46, %c4, %c16_47] : memref<2x8x32xf32, #tpu.memory_space<vmem>>, vector<2x1x16xf32>
    %160 = vector.shape_cast %159 : vector<2x1x16xf32> to vector<2x16xf32>
    %161 = vector.shape_cast %158 : vector<2x16xf32> to vector<2x1x16xf32>
    tpu.vector_store %arg13[%c0_46, %c4, %c16_47], %161 {strides = array<i32>} : memref<2x8x32xf32, #tpu.memory_space<vmem>>, vector<2x1x16xf32>,
    %162 = vector.extract_strided_slice %10 {offsets = [0, 4, 0], sizes = [2, 1, 128], strides = [1, 1, 1]} : vector<2x8x128xf32> to vector<2x1x128xf32>
    %163 = vector.shape_cast %162 : vector<2x1x128xf32> to vector<2x128xf32>
    %cst_48 = arith.constant dense<0.000000e+00> : vector<2x128xf32>
    %164 = tpu.matmul %153, %11, %cst_48 {dimension_numbers = #tpu.dot_dimension_numbers<[1], [0], [0], [1], [0, 0, 1, 1], [], []>} : vector<2x32xf32>, vector<32x128xf32>, vector<2x128xf32> -> vector<2x128xf32>
    %165 = arith.addf %163, %164 : vector<2x128xf32>
    %166 = vector.extract_strided_slice %165 {offsets = [0, 0], sizes = [2, 32], strides = [1, 1]} : vector<2x128xf32> to vector<2x32xf32>
    %167 = arith.negf %166 : vector<2x32xf32>
    %168 = math.exp %167 : vector<2x32xf32>
    %cst_49 = arith.constant 1.000000e+00 : f32
    %169 = vector.broadcast %cst_49 : f32 to vector<2x32xf32>
    %170 = arith.addf %169, %168 : vector<2x32xf32>
    %171 = arith.divf %169, %170 : vector<2x32xf32>
    %172 = vector.extract_strided_slice %165 {offsets = [0, 32], sizes = [2, 32], strides = [1, 1]} : vector<2x128xf32> to vector<2x32xf32>
    %173 = arith.negf %172 : vector<2x32xf32>
    %174 = math.exp %173 : vector<2x32xf32>
    %cst_50 = arith.constant 1.000000e+00 : f32
    %175 = vector.broadcast %cst_50 : f32 to vector<2x32xf32>
    %176 = arith.addf %175, %174 : vector<2x32xf32>
    %177 = arith.divf %175, %176 : vector<2x32xf32>
    %178 = vector.extract_strided_slice %165 {offsets = [0, 64], sizes = [2, 32], strides = [1, 1]} : vector<2x128xf32> to vector<2x32xf32>
    %179 = math.tanh %178 : vector<2x32xf32>
    %180 = vector.extract_strided_slice %165 {offsets = [0, 96], sizes = [2, 32], strides = [1, 1]} : vector<2x128xf32> to vector<2x32xf32>
    %181 = arith.negf %180 : vector<2x32xf32>
    %182 = math.exp %181 : vector<2x32xf32>
    %cst_51 = arith.constant 1.000000e+00 : f32
    %183 = vector.broadcast %cst_51 : f32 to vector<2x32xf32>
    %184 = arith.addf %183, %182 : vector<2x32xf32>
    %185 = arith.divf %183, %184 : vector<2x32xf32>
    %186 = arith.mulf %177, %151 : vector<2x32xf32>
    %187 = arith.mulf %171, %179 : vector<2x32xf32>
    %188 = arith.addf %186, %187 : vector<2x32xf32>
    %189 = math.tanh %188 : vector<2x32xf32>
    %190 = arith.mulf %185, %189 : vector<2x32xf32>
    %191 = vector.extract_strided_slice %190 {offsets = [0, 0], sizes = [2, 16], strides = [1, 1]} : vector<2x32xf32> to vector<2x16xf32>
    %c0_52 = arith.constant 0 : index
    %c4_53 = arith.constant 4 : index
    %c0_54 = arith.constant 0 : index
    %192 = vector.load %arg13[%c0_52, %c4_53, %c0_54] : memref<2x8x32xf32, #tpu.memory_space<vmem>>, vector<2x1x16xf32>
    %193 = vector.shape_cast %192 : vector<2x1x16xf32> to vector<2x16xf32>
    %194 = vector.shape_cast %191 : vector<2x16xf32> to vector<2x1x16xf32>
    tpu.vector_store %arg13[%c0_52, %c4_53, %c0_54], %194 {strides = array<i32>} : memref<2x8x32xf32, #tpu.memory_space<vmem>>, vector<2x1x16xf32>,
    %195 = vector.extract_strided_slice %190 {offsets = [0, 16], sizes = [2, 16], strides = [1, 1]} : vector<2x32xf32> to vector<2x16xf32>
    %c0_55 = arith.constant 0 : index
    %c3_56 = arith.constant 3 : index
    %c16_57 = arith.constant 16 : index
    %196 = vector.load %arg13[%c0_55, %c3_56, %c16_57] : memref<2x8x32xf32, #tpu.memory_space<vmem>>, vector<2x1x16xf32>
    %197 = vector.shape_cast %196 : vector<2x1x16xf32> to vector<2x16xf32>
    %198 = vector.shape_cast %195 : vector<2x16xf32> to vector<2x1x16xf32>
    tpu.vector_store %arg13[%c0_55, %c3_56, %c16_57], %198 {strides = array<i32>} : memref<2x8x32xf32, #tpu.memory_space<vmem>>, vector<2x1x16xf32>,
    %199 = vector.extract_strided_slice %10 {offsets = [0, 5, 0], sizes = [2, 1, 128], strides = [1, 1, 1]} : vector<2x8x128xf32> to vector<2x1x128xf32>
    %200 = vector.shape_cast %199 : vector<2x1x128xf32> to vector<2x128xf32>
    %cst_58 = arith.constant dense<0.000000e+00> : vector<2x128xf32>
    %201 = tpu.matmul %190, %11, %cst_58 {dimension_numbers = #tpu.dot_dimension_numbers<[1], [0], [0], [1], [0, 0, 1, 1], [], []>} : vector<2x32xf32>, vector<32x128xf32>, vector<2x128xf32> -> vector<2x128xf32>
    %202 = arith.addf %200, %201 : vector<2x128xf32>
    %203 = vector.extract_strided_slice %202 {offsets = [0, 0], sizes = [2, 32], strides = [1, 1]} : vector<2x128xf32> to vector<2x32xf32>
    %204 = arith.negf %203 : vector<2x32xf32>
    %205 = math.exp %204 : vector<2x32xf32>
    %cst_59 = arith.constant 1.000000e+00 : f32
    %206 = vector.broadcast %cst_59 : f32 to vector<2x32xf32>
    %207 = arith.addf %206, %205 : vector<2x32xf32>
    %208 = arith.divf %206, %207 : vector<2x32xf32>
    %209 = vector.extract_strided_slice %202 {offsets = [0, 32], sizes = [2, 32], strides = [1, 1]} : vector<2x128xf32> to vector<2x32xf32>
    %210 = arith.negf %209 : vector<2x32xf32>
    %211 = math.exp %210 : vector<2x32xf32>
    %cst_60 = arith.constant 1.000000e+00 : f32
    %212 = vector.broadcast %cst_60 : f32 to vector<2x32xf32>
    %213 = arith.addf %212, %211 : vector<2x32xf32>
    %214 = arith.divf %212, %213 : vector<2x32xf32>
    %215 = vector.extract_strided_slice %202 {offsets = [0, 64], sizes = [2, 32], strides = [1, 1]} : vector<2x128xf32> to vector<2x32xf32>
    %216 = math.tanh %215 : vector<2x32xf32>
    %217 = vector.extract_strided_slice %202 {offsets = [0, 96], sizes = [2, 32], strides = [1, 1]} : vector<2x128xf32> to vector<2x32xf32>
    %218 = arith.negf %217 : vector<2x32xf32>
    %219 = math.exp %218 : vector<2x32xf32>
    %cst_61 = arith.constant 1.000000e+00 : f32
    %220 = vector.broadcast %cst_61 : f32 to vector<2x32xf32>
    %221 = arith.addf %220, %219 : vector<2x32xf32>
    %222 = arith.divf %220, %221 : vector<2x32xf32>
    %223 = arith.mulf %214, %188 : vector<2x32xf32>
    %224 = arith.mulf %208, %216 : vector<2x32xf32>
    %225 = arith.addf %223, %224 : vector<2x32xf32>
    %226 = math.tanh %225 : vector<2x32xf32>
    %227 = arith.mulf %222, %226 : vector<2x32xf32>
    %228 = vector.extract_strided_slice %227 {offsets = [0, 0], sizes = [2, 16], strides = [1, 1]} : vector<2x32xf32> to vector<2x16xf32>
    %c0_62 = arith.constant 0 : index
    %c5_63 = arith.constant 5 : index
    %c0_64 = arith.constant 0 : index
    %229 = vector.load %arg13[%c0_62, %c5_63, %c0_64] : memref<2x8x32xf32, #tpu.memory_space<vmem>>, vector<2x1x16xf32>
    %230 = vector.shape_cast %229 : vector<2x1x16xf32> to vector<2x16xf32>
    %231 = vector.shape_cast %228 : vector<2x16xf32> to vector<2x1x16xf32>
    tpu.vector_store %arg13[%c0_62, %c5_63, %c0_64], %231 {strides = array<i32>} : memref<2x8x32xf32, #tpu.memory_space<vmem>>, vector<2x1x16xf32>,
    %232 = vector.extract_strided_slice %227 {offsets = [0, 16], sizes = [2, 16], strides = [1, 1]} : vector<2x32xf32> to vector<2x16xf32>
    %c0_65 = arith.constant 0 : index
    %c2_66 = arith.constant 2 : index
    %c16_67 = arith.constant 16 : index
    %233 = vector.load %arg13[%c0_65, %c2_66, %c16_67] : memref<2x8x32xf32, #tpu.memory_space<vmem>>, vector<2x1x16xf32>
    %234 = vector.shape_cast %233 : vector<2x1x16xf32> to vector<2x16xf32>
    %235 = vector.shape_cast %232 : vector<2x16xf32> to vector<2x1x16xf32>
    tpu.vector_store %arg13[%c0_65, %c2_66, %c16_67], %235 {strides = array<i32>} : memref<2x8x32xf32, #tpu.memory_space<vmem>>, vector<2x1x16xf32>,
    %236 = vector.extract_strided_slice %10 {offsets = [0, 6, 0], sizes = [2, 1, 128], strides = [1, 1, 1]} : vector<2x8x128xf32> to vector<2x1x128xf32>
    %237 = vector.shape_cast %236 : vector<2x1x128xf32> to vector<2x128xf32>
    %cst_68 = arith.constant dense<0.000000e+00> : vector<2x128xf32>
    %238 = tpu.matmul %227, %11, %cst_68 {dimension_numbers = #tpu.dot_dimension_numbers<[1], [0], [0], [1], [0, 0, 1, 1], [], []>} : vector<2x32xf32>, vector<32x128xf32>, vector<2x128xf32> -> vector<2x128xf32>
    %239 = arith.addf %237, %238 : vector<2x128xf32>
    %240 = vector.extract_strided_slice %239 {offsets = [0, 0], sizes = [2, 32], strides = [1, 1]} : vector<2x128xf32> to vector<2x32xf32>
    %241 = arith.negf %240 : vector<2x32xf32>
    %242 = math.exp %241 : vector<2x32xf32>
    %cst_69 = arith.constant 1.000000e+00 : f32
    %243 = vector.broadcast %cst_69 : f32 to vector<2x32xf32>
    %244 = arith.addf %243, %242 : vector<2x32xf32>
    %245 = arith.divf %243, %244 : vector<2x32xf32>
    %246 = vector.extract_strided_slice %239 {offsets = [0, 32], sizes = [2, 32], strides = [1, 1]} : vector<2x128xf32> to vector<2x32xf32>
    %247 = arith.negf %246 : vector<2x32xf32>
    %248 = math.exp %247 : vector<2x32xf32>
    %cst_70 = arith.constant 1.000000e+00 : f32
    %249 = vector.broadcast %cst_70 : f32 to vector<2x32xf32>
    %250 = arith.addf %249, %248 : vector<2x32xf32>
    %251 = arith.divf %249, %250 : vector<2x32xf32>
    %252 = vector.extract_strided_slice %239 {offsets = [0, 64], sizes = [2, 32], strides = [1, 1]} : vector<2x128xf32> to vector<2x32xf32>
    %253 = math.tanh %252 : vector<2x32xf32>
    %254 = vector.extract_strided_slice %239 {offsets = [0, 96], sizes = [2, 32], strides = [1, 1]} : vector<2x128xf32> to vector<2x32xf32>
    %255 = arith.negf %254 : vector<2x32xf32>
    %256 = math.exp %255 : vector<2x32xf32>
    %cst_71 = arith.constant 1.000000e+00 : f32
    %257 = vector.broadcast %cst_71 : f32 to vector<2x32xf32>
    %258 = arith.addf %257, %256 : vector<2x32xf32>
    %259 = arith.divf %257, %258 : vector<2x32xf32>
    %260 = arith.mulf %251, %225 : vector<2x32xf32>
    %261 = arith.mulf %245, %253 : vector<2x32xf32>
    %262 = arith.addf %260, %261 : vector<2x32xf32>
    %263 = math.tanh %262 : vector<2x32xf32>
    %264 = arith.mulf %259, %263 : vector<2x32xf32>
    %265 = vector.extract_strided_slice %264 {offsets = [0, 0], sizes = [2, 16], strides = [1, 1]} : vector<2x32xf32> to vector<2x16xf32>
    %c0_72 = arith.constant 0 : index
    %c6_73 = arith.constant 6 : index
    %c0_74 = arith.constant 0 : index
    %266 = vector.load %arg13[%c0_72, %c6_73, %c0_74] : memref<2x8x32xf32, #tpu.memory_space<vmem>>, vector<2x1x16xf32>
    %267 = vector.shape_cast %266 : vector<2x1x16xf32> to vector<2x16xf32>
    %268 = vector.shape_cast %265 : vector<2x16xf32> to vector<2x1x16xf32>
    tpu.vector_store %arg13[%c0_72, %c6_73, %c0_74], %268 {strides = array<i32>} : memref<2x8x32xf32, #tpu.memory_space<vmem>>, vector<2x1x16xf32>,
    %269 = vector.extract_strided_slice %264 {offsets = [0, 16], sizes = [2, 16], strides = [1, 1]} : vector<2x32xf32> to vector<2x16xf32>
    %c0_75 = arith.constant 0 : index
    %c1_76 = arith.constant 1 : index
    %c16_77 = arith.constant 16 : index
    %270 = vector.load %arg13[%c0_75, %c1_76, %c16_77] : memref<2x8x32xf32, #tpu.memory_space<vmem>>, vector<2x1x16xf32>
    %271 = vector.shape_cast %270 : vector<2x1x16xf32> to vector<2x16xf32>
    %272 = vector.shape_cast %269 : vector<2x16xf32> to vector<2x1x16xf32>
    tpu.vector_store %arg13[%c0_75, %c1_76, %c16_77], %272 {strides = array<i32>} : memref<2x8x32xf32, #tpu.memory_space<vmem>>, vector<2x1x16xf32>,
    %273 = vector.extract_strided_slice %10 {offsets = [0, 7, 0], sizes = [2, 1, 128], strides = [1, 1, 1]} : vector<2x8x128xf32> to vector<2x1x128xf32>
    %274 = vector.shape_cast %273 : vector<2x1x128xf32> to vector<2x128xf32>
    %cst_78 = arith.constant dense<0.000000e+00> : vector<2x128xf32>
    %275 = tpu.matmul %264, %11, %cst_78 {dimension_numbers = #tpu.dot_dimension_numbers<[1], [0], [0], [1], [0, 0, 1, 1], [], []>} : vector<2x32xf32>, vector<32x128xf32>, vector<2x128xf32> -> vector<2x128xf32>
    %276 = arith.addf %274, %275 : vector<2x128xf32>
    %277 = vector.extract_strided_slice %276 {offsets = [0, 0], sizes = [2, 32], strides = [1, 1]} : vector<2x128xf32> to vector<2x32xf32>
    %278 = arith.negf %277 : vector<2x32xf32>
    %279 = math.exp %278 : vector<2x32xf32>
    %cst_79 = arith.constant 1.000000e+00 : f32
    %280 = vector.broadcast %cst_79 : f32 to vector<2x32xf32>
    %281 = arith.addf %280, %279 : vector<2x32xf32>
    %282 = arith.divf %280, %281 : vector<2x32xf32>
    %283 = vector.extract_strided_slice %276 {offsets = [0, 32], sizes = [2, 32], strides = [1, 1]} : vector<2x128xf32> to vector<2x32xf32>
    %284 = arith.negf %283 : vector<2x32xf32>
    %285 = math.exp %284 : vector<2x32xf32>
    %cst_80 = arith.constant 1.000000e+00 : f32
    %286 = vector.broadcast %cst_80 : f32 to vector<2x32xf32>
    %287 = arith.addf %286, %285 : vector<2x32xf32>
    %288 = arith.divf %286, %287 : vector<2x32xf32>
    %289 = vector.extract_strided_slice %276 {offsets = [0, 64], sizes = [2, 32], strides = [1, 1]} : vector<2x128xf32> to vector<2x32xf32>
    %290 = math.tanh %289 : vector<2x32xf32>
    %291 = vector.extract_strided_slice %276 {offsets = [0, 96], sizes = [2, 32], strides = [1, 1]} : vector<2x128xf32> to vector<2x32xf32>
    %292 = arith.negf %291 : vector<2x32xf32>
    %293 = math.exp %292 : vector<2x32xf32>
    %cst_81 = arith.constant 1.000000e+00 : f32
    %294 = vector.broadcast %cst_81 : f32 to vector<2x32xf32>
    %295 = arith.addf %294, %293 : vector<2x32xf32>
    %296 = arith.divf %294, %295 : vector<2x32xf32>
    %297 = arith.mulf %288, %262 : vector<2x32xf32>
    %298 = arith.mulf %282, %290 : vector<2x32xf32>
    %299 = arith.addf %297, %298 : vector<2x32xf32>
    %300 = math.tanh %299 : vector<2x32xf32>
    %301 = arith.mulf %296, %300 : vector<2x32xf32>
    %302 = vector.extract_strided_slice %301 {offsets = [0, 0], sizes = [2, 16], strides = [1, 1]} : vector<2x32xf32> to vector<2x16xf32>
    %c0_82 = arith.constant 0 : index
    %c7_83 = arith.constant 7 : index
    %c0_84 = arith.constant 0 : index
    %303 = vector.load %arg13[%c0_82, %c7_83, %c0_84] : memref<2x8x32xf32, #tpu.memory_space<vmem>>, vector<2x1x16xf32>
    %304 = vector.shape_cast %303 : vector<2x1x16xf32> to vector<2x16xf32>
    %305 = vector.shape_cast %302 : vector<2x16xf32> to vector<2x1x16xf32>
    tpu.vector_store %arg13[%c0_82, %c7_83, %c0_84], %305 {strides = array<i32>} : memref<2x8x32xf32, #tpu.memory_space<vmem>>, vector<2x1x16xf32>,
    %306 = vector.extract_strided_slice %301 {offsets = [0, 16], sizes = [2, 16], strides = [1, 1]} : vector<2x32xf32> to vector<2x16xf32>
    %c0_85 = arith.constant 0 : index
    %c0_86 = arith.constant 0 : index
    %c16_87 = arith.constant 16 : index
    %307 = vector.load %arg13[%c0_85, %c0_86, %c16_87] : memref<2x8x32xf32, #tpu.memory_space<vmem>>, vector<2x1x16xf32>
    %308 = vector.shape_cast %307 : vector<2x1x16xf32> to vector<2x16xf32>
    %309 = vector.shape_cast %306 : vector<2x16xf32> to vector<2x1x16xf32>
    tpu.vector_store %arg13[%c0_85, %c0_86, %c16_87], %309 {strides = array<i32>} : memref<2x8x32xf32, #tpu.memory_space<vmem>>, vector<2x1x16xf32>,
    %c0_88 = arith.constant 0 : index
    %c0_89 = arith.constant 0 : index
    %c0_90 = arith.constant 0 : index
    %310 = vector.load %arg13[%c0_88, %c0_89, %c0_90] : memref<2x8x32xf32, #tpu.memory_space<vmem>>, vector<2x8x32xf32>
    %c0_91 = arith.constant 0 : index
    %c0_92 = arith.constant 0 : index
    %311 = vector.load %arg7[%c0_91, %c0_92] : memref<32x32xf32, #tpu.memory_space<vmem>>, vector<32x32xf32>
    "tpu.trace_start"() <{level = 10 : i32, message = "bsd,de->bse"}> : () -> ()
    %cst_93 = arith.constant dense<0.000000e+00> : vector<2x8x32xf32>
    %312 = tpu.matmul %310, %311, %cst_93 {dimension_numbers = #tpu.dot_dimension_numbers<[2], [0], [0, 1], [1], [0, 0, 0, 1, 1, 1], [], []>} : vector<2x8x32xf32>, vector<32x32xf32>, vector<2x8x32xf32> -> vector<2x8x32xf32>
    "tpu.trace_stop"() : () -> ()
    "tpu.trace_start"() <{level = 10 : i32, message = "bqd,bkd->bqk"}> : () -> ()
    %cst_94 = arith.constant dense<0.000000e+00> : vector<2x8x8xf32>
    %313 = tpu.matmul %312, %310, %cst_94 {dimension_numbers = #tpu.dot_dimension_numbers<[2], [2], [1], [1], [0, 0, 0, 1, 1, 1], [0], [0]>} : vector<2x8x32xf32>, vector<2x8x32xf32>, vector<2x8x8xf32> -> vector<2x8x8xf32>
    "tpu.trace_stop"() : () -> ()
    %cst_95 = arith.constant dense<0xFF800000> : vector<2x8xf32>
    %314 = vector.multi_reduction <maximumf>, %313, %cst_95 [2] : vector<2x8x8xf32> to vector<2x8xf32>
    %315 = vector.shape_cast %314 : vector<2x8xf32> to vector<2x8x1xf32>
    %316 = vector.broadcast %315 : vector<2x8x1xf32> to vector<2x8x8xf32>
    %317 = arith.subf %313, %316 : vector<2x8x8xf32>
    %318 = math.exp %317 : vector<2x8x8xf32>
    %cst_96 = arith.constant dense<0.000000e+00> : vector<2x8xf32>
    %319 = vector.multi_reduction <add>, %318, %cst_96 [2] : vector<2x8x8xf32> to vector<2x8xf32>
    %320 = vector.shape_cast %319 : vector<2x8xf32> to vector<2x8x1xf32>
    %321 = tpu.reciprocal %320 {approx = true} : vector<2x8x1xf32> -> vector<2x8x1xf32>
    %322 = vector.broadcast %321 : vector<2x8x1xf32> to vector<2x8x8xf32>
    %323 = arith.mulf %318, %322 : vector<2x8x8xf32>
    "tpu.trace_start"() <{level = 10 : i32, message = "bqk,bkd->bqd"}> : () -> ()
    %cst_97 = arith.constant dense<0.000000e+00> : vector<2x8x32xf32>
    %324 = tpu.matmul %323, %310, %cst_97 {dimension_numbers = #tpu.dot_dimension_numbers<[2], [1], [1], [2], [0, 0, 0, 1, 1, 2], [0], [0]>} : vector<2x8x8xf32>, vector<2x8x32xf32>, vector<2x8x32xf32> -> vector<2x8x32xf32>
    "tpu.trace_stop"() : () -> ()
    %c0_98 = arith.constant 0 : index
    %c0_99 = arith.constant 0 : index
    %325 = vector.load %arg8[%c0_98, %c0_99] : memref<32x32xf32, #tpu.memory_space<vmem>>, vector<32x32xf32>
    "tpu.trace_start"() <{level = 10 : i32, message = "bsd,de->bse"}> : () -> ()
    %cst_100 = arith.constant dense<0.000000e+00> : vector<2x8x32xf32>
    %326 = tpu.matmul %324, %325, %cst_100 {dimension_numbers = #tpu.dot_dimension_numbers<[2], [0], [0, 1], [1], [0, 0, 0, 1, 1, 1], [], []>} : vector<2x8x32xf32>, vector<32x32xf32>, vector<2x8x32xf32> -> vector<2x8x32xf32>
    "tpu.trace_stop"() : () -> ()
    %c0_101 = arith.constant 0 : index
    %c0_102 = arith.constant 0 : index
    %327 = vector.load %arg9[%c0_101, %c0_102] : memref<32x32xf32, #tpu.memory_space<vmem>>, vector<32x32xf32>
    "tpu.trace_start"() <{level = 10 : i32, message = "bsd,de->bse"}> : () -> ()
    %cst_103 = arith.constant dense<0.000000e+00> : vector<2x8x32xf32>
    %328 = tpu.matmul %312, %327, %cst_103 {dimension_numbers = #tpu.dot_dimension_numbers<[2], [0], [0, 1], [1], [0, 0, 0, 1, 1, 1], [], []>} : vector<2x8x32xf32>, vector<32x32xf32>, vector<2x8x32xf32> -> vector<2x8x32xf32>
    "tpu.trace_stop"() : () -> ()
    %329 = arith.addf %326, %328 : vector<2x8x32xf32>
    %330 = math.tanh %329 : vector<2x8x32xf32>
    %cst_104 = arith.constant dense<0.000000e+00> : vector<2x32xf32>
    %331 = vector.multi_reduction <add>, %330, %cst_104 [1] : vector<2x8x32xf32> to vector<2x32xf32>
    %cst_105 = arith.constant 0.000000e+00 : f32
    %332 = vector.broadcast %cst_105 : f32 to vector<2x32xf32>
    %333 = arith.maximumf %331, %332 : vector<2x32xf32>
    %c0_106 = arith.constant 0 : index
    %c0_107 = arith.constant 0 : index
    %334 = vector.load %arg10[%c0_106, %c0_107] : memref<32x128xf32, #tpu.memory_space<vmem>>, vector<32x128xf32>
    %cst_108 = arith.constant dense<0.000000e+00> : vector<2x128xf32>
    %335 = tpu.matmul %333, %334, %cst_108 {dimension_numbers = #tpu.dot_dimension_numbers<[1], [0], [0], [1], [0, 0, 1, 1], [], []>} : vector<2x32xf32>, vector<32x128xf32>, vector<2x128xf32> -> vector<2x128xf32>
    %c0_109 = arith.constant 0 : index
    %c0_110 = arith.constant 0 : index
    %336 = vector.load %arg11[%c0_109, %c0_110] : memref<1x128xf32, #tpu.memory_space<vmem>>, vector<1x128xf32>
    %337 = vector.broadcast %336 : vector<1x128xf32> to vector<2x128xf32>
    %338 = arith.addf %335, %337 : vector<2x128xf32>
    %c0_111 = arith.constant 0 : index
    %c0_112 = arith.constant 0 : index
    %339 = vector.load %arg12[%c0_111, %c0_112] : memref<2x128xf32, #tpu.memory_space<vmem>>, vector<2x128xf32>
    tpu.vector_store %arg12[%c0_111, %c0_112], %338 {strides = array<i32>} : memref<2x128xf32, #tpu.memory_space<vmem>>, vector<2x128xf32>,
    return
  }
  func.func @transform_0(%arg0: i32) -> (i32, i32, i32) {
    %c0_i32 = arith.constant 0 : i32
    %c0_i32_0 = arith.constant 0 : i32
    %c0_i32_1 = arith.constant 0 : i32
    return %arg0, %c0_i32, %c0_i32_0 : i32, i32, i32
  }
  func.func @transform_1(%arg0: i32) -> (i32, i32, i32) {
    %c0_i32 = arith.constant 0 : i32
    %c0_i32_0 = arith.constant 0 : i32
    %c0_i32_1 = arith.constant 0 : i32
    return %arg0, %c0_i32, %c0_i32_0 : i32, i32, i32
  }
  func.func @transform_2(%arg0: i32) -> (i32, i32) {
    %c0_i32 = arith.constant 0 : i32
    %c0_i32_0 = arith.constant 0 : i32
    %c0_i32_1 = arith.constant 0 : i32
    return %c0_i32, %c0_i32_0 : i32, i32
  }
  func.func @transform_3(%arg0: i32) -> (i32, i32) {
    %c0_i32 = arith.constant 0 : i32
    %c0_i32_0 = arith.constant 0 : i32
    %c0_i32_1 = arith.constant 0 : i32
    return %c0_i32, %c0_i32_0 : i32, i32
  }
  func.func @transform_4(%arg0: i32) -> (i32, i32) {
    %c0_i32 = arith.constant 0 : i32
    %c0_i32_0 = arith.constant 0 : i32
    %c0_i32_1 = arith.constant 0 : i32
    return %c0_i32, %c0_i32_0 : i32, i32
  }
  func.func @transform_5(%arg0: i32) -> (i32, i32) {
    %c0_i32 = arith.constant 0 : i32
    %c0_i32_0 = arith.constant 0 : i32
    %c0_i32_1 = arith.constant 0 : i32
    return %c0_i32, %c0_i32_0 : i32, i32
  }
  func.func @transform_6(%arg0: i32) -> (i32, i32) {
    %c0_i32 = arith.constant 0 : i32
    %c0_i32_0 = arith.constant 0 : i32
    %c0_i32_1 = arith.constant 0 : i32
    return %c0_i32, %c0_i32_0 : i32, i32
  }
  func.func @transform_7(%arg0: i32) -> (i32, i32) {
    %c0_i32 = arith.constant 0 : i32
    %c0_i32_0 = arith.constant 0 : i32
    %c0_i32_1 = arith.constant 0 : i32
    return %c0_i32, %c0_i32_0 : i32, i32
  }
  func.func @transform_8(%arg0: i32) -> (i32, i32) {
    %c0_i32 = arith.constant 0 : i32
    %c0_i32_0 = arith.constant 0 : i32
    %c0_i32_1 = arith.constant 0 : i32
    return %c0_i32, %c0_i32_0 : i32, i32
  }
  func.func @transform_9(%arg0: i32) -> (i32, i32) {
    %c0_i32 = arith.constant 0 : i32
    %c0_i32_0 = arith.constant 0 : i32
    %c0_i32_1 = arith.constant 0 : i32
    return %c0_i32, %c0_i32_0 : i32, i32
  }
  func.func @transform_10(%arg0: i32) -> (i32, i32) {
    %c0_i32 = arith.constant 0 : i32
    %c0_i32_0 = arith.constant 0 : i32
    %c0_i32_1 = arith.constant 0 : i32
    return %c0_i32, %c0_i32_0 : i32, i32
  }
  func.func @transform_11(%arg0: i32) -> (i32, i32) {
    %c0_i32 = arith.constant 0 : i32
    %c0_i32_0 = arith.constant 0 : i32
    return %arg0, %c0_i32 : i32, i32
  }
}

</mosaic_0001>

<bundles_post_ra>
// kernel: tpu_custom_call.1
= control target key start
LH: loop header
LB: loop body
LE: loop exit
PB: predicated region body
PF: predicated region fallthrough
CT: control target
= control target key end

     0   :  { %16 = vsyncpa [#allocation4], 0  ;;  %s3341_s0 = inlined_call_operand.hbm [shape: f32[2,8,16], index: 0, kind: input, shape index: {}]   ;;  %s3342_s1 = inlined_call_operand.hbm [shape: f32[2,8,16], index: 1, kind: input, shape index: {}]   ;;  %s3343_s2 = inlined_call_operand.hbm [shape: f32[16,128], index: 2, kind: input, shape index: {}]   ;;  %s3344_s3 = inlined_call_operand.hbm [shape: f32[16,128], index: 3, kind: input, shape index: {}]   ;;  %s3345_s4 = inlined_call_operand.vmem [shape: f32[1,128], index: 4, kind: input, shape index: {}]   ;;  %s3346_s5 = inlined_call_operand.hbm [shape: f32[32,128], index: 5, kind: input, shape index: {}]   ;;  %s3347_s6 = inlined_call_operand.hbm [shape: f32[32,32], index: 6, kind: input, shape index: {}]   ;;  %s3348_s7 = inlined_call_operand.hbm [shape: f32[32,32], index: 7, kind: input, shape index: {}]   ;;  %s3349_s8 = inlined_call_operand.hbm [shape: f32[32,32], index: 8, kind: input, shape index: {}]   ;;  %s3350_s9 = inlined_call_operand.hbm [shape: f32[32,128], index: 9, kind: input, shape index: {}]   ;;  %s3351_s10 = inlined_call_operand.vmem [shape: f32[1,128], index: 10, kind: input, shape index: {}]   ;;  %s3352_s11 = inlined_call_operand.hbm [shape: f32[2,128], index: 11, kind: output, shape index: {}]  }
   0x1   :  { %17 = vsyncpa [#allocation7], 0 }
   0x2   :  { %18 = vsyncpa [#allocation10], 0 }
   0x3   :  { %19 = vsyncpa [#allocation13], 0 }
   0x4   :  { %20 = vsyncpa [#allocation16], 0 }
   0x5   :  { %21 = vsyncpa [#allocation5], 0  ;;  %s2894_s17 = smov [#allocation6]   ;;  %s2895_s19 = smov [#allocation9]  }
   0x6   :  { %s39_s18 = sshll.u32 %s2894_s17, 4  ;;  %s63_s20 = sshll.u32 %s2895_s19, 4  ;;  %s40_s18 = int_to_ptr.vmem [resolvable:$true] %s39_s18  ;;  %s64_s20 = int_to_ptr.vmem [resolvable:$true] %s63_s20 }
   0x7   :  { %s2690_s21 = scalar_lea.vmem %s40_s18, 256  ;;  %p2695_p1 = scmp.lt.s32.totalorder %s40_s18, %s40_s18 }
   0x8   :  { %p2691_p0 = scmp.ne.s32.totalorder %s40_s18, %s2690_s21  ;;  %p2696_p2 = scmp.lt.s32.totalorder %s2690_s21, %s2690_s21 }
   0xa   :  { %p2697_p3 = por %p2696_p2, %p2695_p1 }
   0xc   :  { %p2698_p4 = pnand %p2697_p3, %p2691_p0 }
   0xe   :  { %2701 = shalt.err (!%p2698_p4)
}
   0xf   :  { %s2896_s22 = smov 128   ;;  %s2897_s23 = smov 8  }
  0x10   :  { %45 = dma.hbm_to_vmem [thread:$0]  %s3342_s1, 256, %s40_s18, [#allocation7], %s2896_s22, %s2896_s22, %s2897_s23  }
  0x11   :  { %s2710_s26 = scalar_lea.vmem %s64_s20, 256  ;;  %p2715_p6 = scmp.lt.s32.totalorder %s64_s20, %s64_s20 }
  0x12   :  { %p2711_p5 = scmp.ne.s32.totalorder %s64_s20, %s2710_s26  ;;  %p2716_p7 = scmp.lt.s32.totalorder %s2710_s26, %s2710_s26 }
  0x14   :  { %p2717_p8 = por %p2716_p7, %p2715_p6 }
  0x16   :  { %p2718_p9 = pnand %p2717_p8, %p2711_p5 }
  0x18   :  { %2721 = shalt.err (!%p2718_p9)
}
  0x19   :  { %69 = dma.hbm_to_vmem [thread:$0]  %s3344_s3, 256, %s64_s20, [#allocation10], %s2896_s22, %s2896_s22, %s2897_s23  }
  0x1a   :  { %s2898_s29 = smov [#allocation12]   ;;  %s2899_s12 = smov [#allocation15]  }
  0x1b   :  { %s89_s30 = sshll.u32 %s2898_s29, 4  ;;  %s113_s13 = sshll.u32 %s2899_s12, 4  ;;  %s90_s30 = int_to_ptr.vmem [resolvable:$true] %s89_s30  ;;  %s114_s13 = int_to_ptr.vmem [resolvable:$true] %s113_s13 }
  0x1c   :  { %s2730_s1 = scalar_lea.vmem %s90_s30, 512  ;;  %p2735_p11 = scmp.lt.s32.totalorder %s90_s30, %s90_s30 }
  0x1d   :  { %p2731_p10 = scmp.ne.s32.totalorder %s90_s30, %s2730_s1  ;;  %p2736_p12 = scmp.lt.s32.totalorder %s2730_s1, %s2730_s1 }
  0x1f   :  { %p2737_p13 = por %p2736_p12, %p2735_p11 }
  0x21   :  { %p2738_p0 = pnand %p2737_p13, %p2731_p10 }
  0x23   :  { %2741 = shalt.err (!%p2738_p0)
}
  0x24   :  { %95 = dma.hbm_to_vmem [thread:$0]  %s3347_s6, 512, %s90_s30, [#allocation13], %s2896_s22, %s2896_s22, %s2897_s23  }
  0x25   :  { %s2750_s3 = scalar_lea.vmem %s114_s13, 512  ;;  %p2755_p2 = scmp.lt.s32.totalorder %s114_s13, %s114_s13 }
  0x26   :  { %p2751_p1 = scmp.ne.s32.totalorder %s114_s13, %s2750_s3  ;;  %p2756_p3 = scmp.lt.s32.totalorder %s2750_s3, %s2750_s3 }
  0x28   :  { %p2757_p4 = por %p2756_p3, %p2755_p2 }
  0x2a   :  { %p2758_p5 = pnand %p2757_p4, %p2751_p1 }
  0x2c   :  { %2761 = shalt.err (!%p2758_p5)
}
  0x2d   :  { %119 = dma.hbm_to_vmem [thread:$0]  %s3349_s8, 512, %s114_s13, [#allocation16], %s2896_s22, %s2896_s22, %s2897_s23  }
  0x2e   :  { %s2900_s18 = smov [#allocation3]   ;;  %s2901_s20 = smov [#allocation8]  }
  0x2f   :  { %s27_s19 = sshll.u32 %s2900_s18, 4  ;;  %s51_s21 = sshll.u32 %s2901_s20, 4  ;;  %s28_s19 = int_to_ptr.vmem [resolvable:$true] %s27_s19  ;;  %s52_s21 = int_to_ptr.vmem [resolvable:$true] %s51_s21 }
  0x30   :  { %s2770_s6 = scalar_lea.vmem %s28_s19, 256  ;;  %p2775_p7 = scmp.lt.s32.totalorder %s28_s19, %s28_s19 }
  0x31   :  { %p2771_p6 = scmp.ne.s32.totalorder %s28_s19, %s2770_s6  ;;  %p2776_p8 = scmp.lt.s32.totalorder %s2770_s6, %s2770_s6 }
  0x33   :  { %p2777_p9 = por %p2776_p8, %p2775_p7 }
  0x35   :  { %p2778_p10 = pnand %p2777_p9, %p2771_p6 }
  0x37   :  { %2781 = shalt.err (!%p2778_p10)
}
  0x38   :  { %33 = dma.hbm_to_vmem [thread:$0]  %s3341_s0, 256, %s28_s19, [#allocation4], %s2896_s22, %s2896_s22, %s2897_s23  }
  0x39   :  { %s2790_s8 = scalar_lea.vmem %s52_s21, 256  ;;  %p2795_p12 = scmp.lt.s32.totalorder %s52_s21, %s52_s21 }
  0x3a   :  { %p2791_p11 = scmp.ne.s32.totalorder %s52_s21, %s2790_s8  ;;  %p2796_p13 = scmp.lt.s32.totalorder %s2790_s8, %s2790_s8 }
  0x3c   :  { %p2797_p0 = por %p2796_p13, %p2795_p12 }
  0x3e   :  { %p2798_p1 = pnand %p2797_p0, %p2791_p11 }
  0x40   :  { %2801 = shalt.err (!%p2798_p1)
}
  0x41   :  { %57 = dma.hbm_to_vmem [thread:$0]  %s3343_s2, 256, %s52_s21, [#allocation7], %s2896_s22, %s2896_s22, %s2897_s23  }
  0x42   :  { %s2902_s28 = smov [#allocation11]   ;;  %s2903_s30 = smov [#allocation14]  }
  0x43   :  { %s77_s29 = sshll.u32 %s2902_s28, 4  ;;  %s101_s12 = sshll.u32 %s2903_s30, 4  ;;  %s78_s29 = int_to_ptr.vmem [resolvable:$true] %s77_s29  ;;  %s102_s12 = int_to_ptr.vmem [resolvable:$true] %s101_s12 }
  0x44   :  { %s2810_s0 = scalar_lea.vmem %s78_s29, 512  ;;  %p2815_p3 = scmp.lt.s32.totalorder %s78_s29, %s78_s29 }
  0x45   :  { %p2811_p2 = scmp.ne.s32.totalorder %s78_s29, %s2810_s0  ;;  %p2816_p4 = scmp.lt.s32.totalorder %s2810_s0, %s2810_s0 }
  0x47   :  { %p2817_p5 = por %p2816_p4, %p2815_p3 }
  0x49   :  { %p2818_p6 = pnand %p2817_p5, %p2811_p2 }
  0x4b   :  { %2821 = shalt.err (!%p2818_p6)
}
  0x4c   :  { %83 = dma.hbm_to_vmem [thread:$0]  %s3346_s5, 512, %s78_s29, [#allocation10], %s2896_s22, %s2896_s22, %s2897_s23  }
  0x4d   :  { %s2830_s2 = scalar_lea.vmem %s102_s12, 512  ;;  %p2835_p8 = scmp.lt.s32.totalorder %s102_s12, %s102_s12 }
  0x4e   :  { %p2831_p7 = scmp.ne.s32.totalorder %s102_s12, %s2830_s2  ;;  %p2836_p9 = scmp.lt.s32.totalorder %s2830_s2, %s2830_s2 }
  0x50   :  { %p2837_p10 = por %p2836_p9, %p2835_p8 }
  0x52   :  { %p2838_p11 = pnand %p2837_p10, %p2831_p7 }
  0x54   :  { %2841 = shalt.err (!%p2838_p11)
}
  0x55   :  { %107 = dma.hbm_to_vmem [thread:$0]  %s3348_s7, 512, %s102_s12, [#allocation13], %s2896_s22, %s2896_s22, %s2897_s23  }
  0x56   :  { %s2904_s3 = smov [#allocation17]  }
  0x57   :  { %s125_s16 = sshll.u32 %s2904_s3, 4  ;;  %s126_s16 = int_to_ptr.vmem [resolvable:$true] %s125_s16 }
  0x58   :  { %s2850_s17 = scalar_lea.vmem %s126_s16, 512  ;;  %p2855_p13 = scmp.lt.s32.totalorder %s126_s16, %s126_s16 }
  0x59   :  { %p2851_p12 = scmp.ne.s32.totalorder %s126_s16, %s2850_s17  ;;  %p2856_p0 = scmp.lt.s32.totalorder %s2850_s17, %s2850_s17 }
  0x5b   :  { %p2857_p1 = por %p2856_p0, %p2855_p13 }
  0x5d   :  { %p2858_p2 = pnand %p2857_p1, %p2851_p12 }
  0x5f   :  { %2861 = shalt.err (!%p2858_p2)
}
  0x60   :  { %131 = dma.hbm_to_vmem [thread:$0]  %s3350_s9, 512, %s126_s16, [#allocation16], %s2896_s22, %s2896_s22, %s2897_s23  }
  0x61   :  { %2882 = dma.done.wait [#allocation4], 256  }
  0x62   :  { %2883 = vsyncadd [#allocation4], 4294967040 }
  0x63   :  { %2884 = dma.done.wait [#allocation7], 512  }
  0x64   :  { %2885 = vsyncadd [#allocation7], 4294966784 }
  0x65   :  { %2886 = dma.done.wait [#allocation10], 768  }
  0x66   :  { %2887 = vsyncadd [#allocation10], 4294966528 }
  0x67   :  { %2888 = dma.done.wait [#allocation13], 1024  }
  0x68   :  { %2889 = vsyncadd [#allocation13], 4294966272 }
  0x69   :  { %2890 = dma.done.wait [#allocation16], 1024  }
  0x6a   :  { %2891 = vsyncadd [#allocation16], 4294966272  ;;  %v2905_v0 = vmov 0.0   ;;  %vm2906_vm0 = vmmov 0   ;;  %vm169_vm1 = vcmask 130048   ;;  %v168_v1 = vld [vmem:[#allocation9 + $0x8] sm:$0xff] }
  0x6b   :  { %2374 = vmatprep.subr.mxu0 %v2905_v0  ;;  %2382 = vmatprep.mubr.msk.f32.mxu0 %vm2906_vm0, %v2905_v0  ;;  %v167_v2 = vld [vmem:[#allocation9] sm:$0xff]  ;;  %v3027_v3 = vld [vmem:[#allocation11 + $0x18] sm:$0xff]  ;;  %v166_v6 = vld [vmem:[#allocation8 + $0x8] sm:$0xff]  ;;  %s2907_s22 = smov 64   ;;  %vm488_vm2 = vcmask 1041409   ;;  %vm345_vm3 = vcmask 261120  }
  0x6c   :  { %2360 = vmatprep.subr.mxu1 %v168_v1  ;;  %2375 = vmatpush3.msra.mxu0 %v3027_v3  ;;  %v163_v4 = vld [vmem:[#allocation6] sm:$0xff]  ;;  %v164_v5 = vld [vmem:[#allocation6 + $0x8] sm:$0xff]  ;;  %v165_v8 = vld [vmem:[#allocation8] sm:$0xff]  ;;  %vm481_vm4 = vcmask 122880   ;;  %vm484_vm5 = vcmask 254080   ;;  %vm632_vm6 = vcmask 123905  }
  0x6d   :  { %2361 = vmatpush3.msra.mxu1 %v168_v1  ;;  %2364 = vmatprep.mubr.msk.f32.mxu1 %vm169_vm1, %v163_v4  ;;  %v3031_v7 = vld [vmem:[#allocation11 + $0x10] sm:$0xff]  ;;  %v3035_v9 = vld [vmem:[#allocation11 + $0x8] sm:$0xff]  ;;  %v161_v10 = vld [vmem:[#allocation3] sm:$0xff]  ;;  %vm635_vm7 = vcmask 255105   ;;  %vm783_vm8 = vcmask 124930   ;;  %vm786_vm9 = vcmask 256130  }
  0x6e   :  { %2362 = vmatprep.subr.mxu1 %v167_v2  ;;  %2376 = vmatprep.subr.mxu0 %v2905_v0  ;;  %v162_v11 = vld [vmem:[#allocation3 + $0x8] sm:$0xff]  ;;  %v3040_v12 = vld [vmem:[#allocation11] sm:$0xff]  ;;  %v2243_v16 = vld [vmem:[%s3345_s4] ss:$0 sm:$0xff]  ;;  %s2908_s4 = smov 32   ;;  %vm935_vm10 = vcmask 125955  }
  0x6f   :  { %2363 = vmatpush3.msra.mxu1 %v167_v2  ;;  %2377 = vmatpush3.msra.mxu0 %v3031_v7  ;;  %vm938_vm11 = vcmask 257155   ;;  %vm1087_vm12 = vcmask 126980   ;;  %vm1090_vm13 = vcmask 258180   ;;  %vm1239_vm14 = vcmask 128005   ;;  %s2909_s20 = smov [#allocation18]  }
  0x70   :  { %2365 = vmatmul.mubr.msk.f32.vlgmr.msra.gmra.mxu1 %vm169_vm1, %v164_v5  ;;  %2367 = vmatprep.subr.mxu1 %v166_v6  ;;  %vm1242_vm15 = vcmask 259205   ;;  %s2226_s21 = sshll.u32 %s2909_s20, 4  ;;  %s2227_s21 = int_to_ptr.vmem [resolvable:$true] %s2226_s21 }
  0x71   :  { %2368 = vmatpush3.msra.mxu1 %v166_v6  ;;  %2378 = vmatprep.subr.mxu0 %v2905_v0  ;;  %s2862_s6 = scalar_lea.vmem %s2227_s21, 32  ;;  %p2867_p4 = scmp.lt.s32.totalorder %s2227_s21, %s2227_s21 }
  0x72   :  { %2369 = vmatprep.subr.mxu1 %v165_v8  ;;  %2379 = vmatpush3.msra.mxu0 %v3035_v9  ;;  %p2863_p3 = scmp.ne.s32.totalorder %s2227_s21, %s2862_s6  ;;  %p2868_p5 = scmp.lt.s32.totalorder %s2862_s6, %s2862_s6 }
  0x73   :  { %2370 = vmatpush3.msra.mxu1 %v165_v8  ;;  %2371 = vmatprep.mubr.msk.f32.mxu1 %vm169_vm1, %v161_v10 }
  0x74   :  { %2380 = vmatprep.subr.mxu0 %v2905_v0  ;;  %2372 = vmatmul.mubr.msk.f32.vlgmr.msra.gmra.mxu1 %vm169_vm1, %v162_v11  ;;  %vm1391_vm1 = vcmask 129030   ;;  %p2869_p6 = por %p2868_p5, %p2867_p4 }
  0x75   :  { %2381 = vmatpush3.msra.mxu0 %v3040_v12  ;;  %2385 = vmatprep.subr.mxu1 %v2905_v0 }
  0x76   :  { %2383 = vmatmul.mubr.f32.vlgmr.msra.gmra.mxu0 %v2905_v0  ;;  %2386 = vmatpush3.msra.mxu1 %v3027_v3  ;;  %p2870_p7 = pnand %p2869_p6, %p2863_p3 }
  0x77   :  { %2387 = vmatprep.subr.mxu1 %v2905_v0  ;;  %2393 = vmatprep.mubr.msk.f32.mxu1 %vm2906_vm0, %v2905_v0 }
  0x78   :  { %2388 = vmatpush3.msra.mxu1 %v3031_v7  ;;  %2396 = vmatprep.subr.mxu0 %v2905_v0 }
  0x79   :  { %2389 = vmatprep.subr.mxu1 %v2905_v0  ;;  %2397 = vmatpush3.msra.mxu0 %v3027_v3 }
  0x7a   :  { %2390 = vmatpush3.msra.mxu1 %v3035_v9  ;;  %2398 = vmatprep.subr.mxu0 %v2905_v0 }
  0x7b   :  { %2391 = vmatprep.subr.mxu1 %v2905_v0  ;;  %2399 = vmatpush3.msra.mxu0 %v3031_v7 }
  0x7c   :  { %2392 = vmatpush3.msra.mxu1 %v3040_v12  ;;  %2400 = vmatprep.subr.mxu0 %v2905_v0 }
  0x7d   :  { %2401 = vmatpush3.msra.mxu0 %v3035_v9  ;;  %2404 = vmatprep.mubr.msk.f32.mxu0 %vm2906_vm0, %v2905_v0 }
  0x7e   :  { %2402 = vmatprep.subr.mxu0 %v2905_v0  ;;  %2407 = vmatprep.subr.mxu1 %v2905_v0 }
  0x7f   :  { %2403 = vmatpush3.msra.mxu0 %v3040_v12 }
  0x80   :  { %2418 = vmatprep.subr.mxu0 %v2905_v0 }
 0x130   :  { %v2366_v13 = vpop.f32.mrf.mxu1 }
 0x132   :  { %v242_v14 = vpop.f32.mrf.mxu1 }
 0x134   :  { %v2373_v15 = vpop.f32.mrf.mxu1 }
 0x135   :  { %v329_v17 = vadd.f32 %v2373_v15, %v2366_v13 }
 0x136   :  { %v415_v18 = vpop.f32.mrf.mxu0  ;;  %v323_v19 = vpop.f32.mrf.mxu1 }
 0x137   :  { %v3072_v20 = vadd.f32 %v2243_v16, %v329_v17  ;;  %v420_v21 = vrot.slane %v415_v18, 1  ;;  %v324_v22 = vadd.f32 %v323_v19, %v242_v14 }
 0x138   :  { %v2384_v23 = vpop.f32.mrf.mxu0 }
 0x139   :  { %v424_v24 = vadd.f32 %v420_v21, %v3072_v20  ;;  %v3075_v25 = vadd.f32 %v2243_v16, %v324_v22 }
 0x13b   :  { %2542 = vtanh.f32 %v424_v24  ;;  %v423_v26 = vadd.f32 %v415_v18, %v3075_v25  ;;  %v2245_v29 = vmul.f32 -1.442695, %v424_v24 }
 0x13d   :  { %2544 = vtanh.f32 %v423_v26  ;;  %v2244_v30 = vmul.f32 -1.442695, %v423_v26 }
 0x13e   :  { %2546 = vpow2.f32 %v2245_v29 }
 0x13f   :  { %2548 = vpow2.f32 %v2244_v30 }
 0x148   :  { %v2543_v27 = vpop.eup %2542 }
 0x149   :  { %445 = vrot.lane.b32.xlu0 %v2543_v27, %s2907_s22 }
 0x14a   :  { %v2545_v28 = vpop.eup %2544 }
 0x14b   :  { %v2547_v31 = vpop.eup %2546 }
 0x14c   :  { %v432_v32 = vadd.f32 1.0, %v2547_v31  ;;  %v2549_v33 = vpop.eup %2548 }
 0x14d   :  { %443 = vrot.lane.b32.xlu0 %v2545_v28, %s2907_s22  ;;  %v431_v34 = vadd.f32 1.0, %v2549_v33 }
 0x14e   :  { %2550 = vrcp.f32 %v432_v32 }
 0x14f   :  { %2552 = vrcp.f32 %v431_v34 }
 0x15b   :  { %v2551_v35 = vpop.eup %2550 }
 0x15c   :  { %v2553_v38 = vpop.eup %2552  ;;  %v440_v41 = vmul.f32 0.0, %v2551_v35 }
 0x15d   :  { %v439_v44 = vmul.f32 0.0, %v2553_v38 }
 0x1bb   :  { %v446_v36 = vpop.permute.xlu0 %445 }
 0x1bc   :  { %v450_v37 = vmul.f32 %v2551_v35, %v446_v36 }
 0x1be   :  { %455 = vrot.lane.b32.xlu1 %v450_v37, %s2908_s4 }
 0x1bf   :  { %v444_v39 = vpop.permute.xlu0 %443 }
 0x1c0   :  { %v449_v40 = vmul.f32 %v2553_v38, %v444_v39 }
 0x1c2   :  { %453 = vrot.lane.b32.xlu1 %v449_v40, %s2908_s4 }
 0x230   :  { %v456_v42 = vpop.permute.xlu1 %455 }
 0x231   :  { %v460_v43 = vadd.f32 %v456_v42, %v440_v41 }
 0x233   :  { %2554 = vtanh.f32 %v460_v43  ;;  %v587_v16 = vrot.slane %v460_v43, 7 }
 0x234   :  { %v454_v45 = vpop.permute.xlu1 %453 }
 0x235   :  { %v459_v46 = vadd.f32 %v454_v45, %v439_v44 }
 0x237   :  { %2556 = vtanh.f32 %v459_v46  ;;  %v586_v18 = vrot.slane %v459_v46, 7 }
 0x240   :  { %v2555_v47 = vpop.eup %2554 }
 0x241   :  { %467 = vrot.lane.b32.xlu0 %v2555_v47, %s2907_s22 }
 0x244   :  { %v2557_v48 = vpop.eup %2556 }
 0x245   :  { %465 = vrot.lane.b32.xlu1 %v2557_v48, %s2907_s22 }
 0x2b3   :  { %v468_v49 = vpop.permute.xlu0 %467 }
 0x2b4   :  { %v3084_v50 = vmul.f32 %v2551_v35, %v468_v49 }
 0x2b6   :  { %v487_v52 = vrot.slane %v3084_v50, 7 }
 0x2b7   :  { %v466_v51 = vpop.permute.xlu1 %465 }
 0x2b8   :  { %v3087_v53 = vmul.f32 %v2553_v38, %v466_v51 }
 0x2ba   :  { %v489_v54 = vsel %vm488_vm2, %v487_v52, %v3087_v53 }
 0x2bb   :  { %490 = vrot.lane.b32.xlu0 %v489_v54, %s2908_s4 }
 0x32d   :  { %v491_v55 = vpop.permute.xlu0 %490 }
 0x32e   :  { %2394 = vmatmul.mubr.msk.f32.vlgmr.msra.gmra.mxu1 %vm345_vm3, %v491_v55 }
 0x32f   :  { %2408 = vmatpush3.msra.mxu1 %v3027_v3  ;;  %2415 = vmatprep.mubr.msk.f32.mxu1 %vm2906_vm0, %v2905_v0 }
 0x330   :  { %2409 = vmatprep.subr.mxu1 %v2905_v0 }
 0x331   :  { %2410 = vmatpush3.msra.mxu1 %v3031_v7 }
 0x332   :  { %2411 = vmatprep.subr.mxu1 %v2905_v0 }
 0x333   :  { %2412 = vmatpush3.msra.mxu1 %v3035_v9 }
 0x334   :  { %2413 = vmatprep.subr.mxu1 %v2905_v0 }
 0x335   :  { %2414 = vmatpush3.msra.mxu1 %v3040_v12 }
 0x336   :  { %2429 = vmatprep.subr.mxu1 %v2905_v0 }
 0x3ee   :  { %v560_v56 = vpop.f32.mrf.mxu1 }
 0x3ef   :  { %v565_v57 = vrot.slane %v560_v56, 7  ;;  %v569_v58 = vadd.f32 %v560_v56, %v3072_v20 }
 0x3f0   :  { %v2395_v59 = vpop.f32.mrf.mxu1 }
 0x3f1   :  { %v568_v60 = vadd.f32 %v565_v57, %v3075_v25  ;;  %2558 = vtanh.f32 %v569_v58  ;;  %v2248_v63 = vmul.f32 -1.442695, %v569_v58 }
 0x3f3   :  { %2560 = vtanh.f32 %v568_v60  ;;  %v2247_v1 = vmul.f32 -1.442695, %v568_v60 }
 0x3f4   :  { %2562 = vpow2.f32 %v2248_v63 }
 0x3f5   :  { %2564 = vpow2.f32 %v2247_v1 }
 0x3fe   :  { %v2559_v61 = vpop.eup %2558 }
 0x3ff   :  { %596 = vrot.lane.b32.xlu0 %v2559_v61, %s2907_s22 }
 0x400   :  { %v2561_v62 = vpop.eup %2560 }
 0x401   :  { %594 = vrot.lane.b32.xlu1 %v2561_v62, %s2907_s22  ;;  %v2563_v2 = vpop.eup %2562 }
 0x402   :  { %v2565_v4 = vpop.eup %2564  ;;  %v577_v5 = vadd.f32 1.0, %v2563_v2 }
 0x403   :  { %v576_v6 = vadd.f32 1.0, %v2565_v4 }
 0x404   :  { %2566 = vrcp.f32 %v577_v5 }
 0x405   :  { %2568 = vrcp.f32 %v576_v6 }
 0x411   :  { %v2567_v8 = vpop.eup %2566 }
 0x412   :  { %v2569_v13 = vpop.eup %2568  ;;  %v591_v17 = vmul.f32 %v2567_v8, %v587_v16 }
 0x413   :  { %v590_v22 = vmul.f32 %v2569_v13, %v586_v18 }
 0x471   :  { %v597_v10 = vpop.permute.xlu0 %596 }
 0x472   :  { %v601_v11 = vmul.f32 %v2567_v8, %v597_v10 }
 0x473   :  { %v595_v14 = vpop.permute.xlu1 %594 }
 0x474   :  { %606 = vrot.lane.b32.xlu0 %v601_v11, %s2908_s4  ;;  %v600_v15 = vmul.f32 %v2569_v13, %v595_v14 }
 0x476   :  { %604 = vrot.lane.b32.xlu1 %v600_v15, %s2908_s4 }
 0x4e6   :  { %v607_v19 = vpop.permute.xlu0 %606 }
 0x4e7   :  { %v611_v21 = vadd.f32 %v607_v19, %v591_v17 }
 0x4e8   :  { %v605_v23 = vpop.permute.xlu1 %604 }
 0x4e9   :  { %2570 = vtanh.f32 %v611_v21  ;;  %v610_v24 = vadd.f32 %v605_v23, %v590_v22  ;;  %v738_v58 = vrot.slane %v611_v21, 7 }
 0x4eb   :  { %2572 = vtanh.f32 %v610_v24  ;;  %v737_v57 = vrot.slane %v610_v24, 7 }
 0x4f6   :  { %v2571_v26 = vpop.eup %2570 }
 0x4f7   :  { %618 = vrot.lane.b32.xlu0 %v2571_v26, %s2907_s22 }
 0x4f8   :  { %v2573_v27 = vpop.eup %2572 }
 0x4f9   :  { %616 = vrot.lane.b32.xlu1 %v2573_v27, %s2907_s22 }
 0x569   :  { %v619_v28 = vpop.permute.xlu0 %618 }
 0x56a   :  { %v3113_v31 = vmul.f32 %v2567_v8, %v619_v28 }
 0x56b   :  { %v617_v29 = vpop.permute.xlu1 %616 }
 0x56c   :  { %v3111_v30 = vmul.f32 %v2569_v13, %v617_v29 }
 0x56e   :  { %v638_v32 = vrot.slane %v3111_v30, 1 }
 0x570   :  { %v639_v33 = vsel %vm488_vm2, %v3113_v31, %v638_v32 }
 0x571   :  { %640 = vrot.lane.b32.xlu1 %v639_v33, %s2908_s4 }
 0x5e3   :  { %v641_v34 = vpop.permute.xlu1 %640 }
 0x5e4   :  { %2405 = vmatmul.mubr.msk.f32.vlgmr.msra.gmra.mxu0 %vm345_vm3, %v641_v34 }
 0x5e5   :  { %2419 = vmatpush3.msra.mxu0 %v3027_v3  ;;  %2426 = vmatprep.mubr.msk.f32.mxu0 %vm2906_vm0, %v2905_v0 }
 0x5e6   :  { %2420 = vmatprep.subr.mxu0 %v2905_v0 }
 0x5e7   :  { %2421 = vmatpush3.msra.mxu0 %v3031_v7 }
 0x5e8   :  { %2422 = vmatprep.subr.mxu0 %v2905_v0 }
 0x5e9   :  { %2423 = vmatpush3.msra.mxu0 %v3035_v9 }
 0x5ea   :  { %2424 = vmatprep.subr.mxu0 %v2905_v0 }
 0x5eb   :  { %2425 = vmatpush3.msra.mxu0 %v3040_v12 }
 0x5ec   :  { %2440 = vmatprep.subr.mxu0 %v2905_v0 }
 0x6a4   :  { %v710_v35 = vpop.f32.mrf.mxu0 }
 0x6a5   :  { %v715_v36 = vrot.slane %v710_v35, 6  ;;  %v716_v37 = vrot.slane %v710_v35, 7 }
 0x6a6   :  { %v2406_v38 = vpop.f32.mrf.mxu0 }
 0x6a7   :  { %v719_v39 = vadd.f32 %v715_v36, %v3075_v25  ;;  %v720_v40 = vadd.f32 %v716_v37, %v3072_v20 }
 0x6a9   :  { %2574 = vtanh.f32 %v719_v39  ;;  %v2250_v43 = vmul.f32 -1.442695, %v719_v39  ;;  %v2251_v44 = vmul.f32 -1.442695, %v720_v40 }
 0x6aa   :  { %2576 = vtanh.f32 %v720_v40 }
 0x6ab   :  { %2578 = vpow2.f32 %v2250_v43 }
 0x6ac   :  { %2580 = vpow2.f32 %v2251_v44 }
 0x6b6   :  { %v2575_v41 = vpop.eup %2574 }
 0x6b7   :  { %v2577_v42 = vpop.eup %2576  ;;  %745 = vrot.lane.b32.xlu0 %v2575_v41, %s2907_s22 }
 0x6b8   :  { %747 = vrot.lane.b32.xlu1 %v2577_v42, %s2907_s22  ;;  %v2579_v45 = vpop.eup %2578 }
 0x6b9   :  { %v2581_v46 = vpop.eup %2580  ;;  %v727_v47 = vadd.f32 1.0, %v2579_v45 }
 0x6ba   :  { %v728_v48 = vadd.f32 1.0, %v2581_v46 }
 0x6bb   :  { %2582 = vrcp.f32 %v727_v47 }
 0x6bc   :  { %2584 = vrcp.f32 %v728_v48 }
 0x6c8   :  { %v2583_v49 = vpop.eup %2582 }
 0x6c9   :  { %v2585_v52 = vpop.eup %2584  ;;  %v741_v59 = vmul.f32 %v2583_v49, %v737_v57 }
 0x6ca   :  { %v742_v60 = vmul.f32 %v2585_v52, %v738_v58 }
 0x729   :  { %v746_v51 = vpop.permute.xlu0 %745 }
 0x72a   :  { %v748_v54 = vpop.permute.xlu1 %747  ;;  %v751_v55 = vmul.f32 %v2583_v49, %v746_v51 }
 0x72b   :  { %v752_v56 = vmul.f32 %v2585_v52, %v748_v54 }
 0x72c   :  { %755 = vrot.lane.b32.xlu0 %v751_v55, %s2908_s4 }
 0x72d   :  { %757 = vrot.lane.b32.xlu1 %v752_v56, %s2908_s4 }
 0x79e   :  { %v756_v61 = vpop.permute.xlu0 %755 }
 0x79f   :  { %v758_v62 = vpop.permute.xlu1 %757  ;;  %v761_v63 = vadd.f32 %v756_v61, %v741_v59 }
 0x7a0   :  { %v762_v1 = vadd.f32 %v758_v62, %v742_v60 }
 0x7a1   :  { %2586 = vtanh.f32 %v761_v63  ;;  %v889_v40 = vrot.slane %v761_v63, 7 }
 0x7a2   :  { %2588 = vtanh.f32 %v762_v1  ;;  %v890_v41 = vrot.slane %v762_v1, 7 }
 0x7ae   :  { %v2587_v2 = vpop.eup %2586 }
 0x7af   :  { %v2589_v4 = vpop.eup %2588  ;;  %767 = vrot.lane.b32.xlu0 %v2587_v2, %s2907_s22 }
 0x7b0   :  { %769 = vrot.lane.b32.xlu1 %v2589_v4, %s2907_s22 }
 0x821   :  { %v768_v5 = vpop.permute.xlu0 %767 }
 0x822   :  { %v770_v6 = vpop.permute.xlu1 %769  ;;  %v3138_v8 = vmul.f32 %v2583_v49, %v768_v5 }
 0x823   :  { %v3140_v10 = vmul.f32 %v2585_v52, %v770_v6 }
 0x824   :  { %v789_v11 = vrot.slane %v3138_v8, 2 }
 0x825   :  { %v790_v13 = vrot.slane %v3140_v10, 1 }
 0x827   :  { %v791_v14 = vsel %vm488_vm2, %v790_v13, %v789_v11 }
 0x828   :  { %792 = vrot.lane.b32.xlu0 %v791_v14, %s2908_s4 }
 0x89a   :  { %v793_v15 = vpop.permute.xlu0 %792 }
 0x89b   :  { %2416 = vmatmul.mubr.msk.f32.vlgmr.msra.gmra.mxu1 %vm345_vm3, %v793_v15 }
 0x89c   :  { %2430 = vmatpush3.msra.mxu1 %v3027_v3  ;;  %2437 = vmatprep.mubr.msk.f32.mxu1 %vm2906_vm0, %v2905_v0 }
 0x89d   :  { %2431 = vmatprep.subr.mxu1 %v2905_v0 }
 0x89e   :  { %2432 = vmatpush3.msra.mxu1 %v3031_v7 }
 0x89f   :  { %2433 = vmatprep.subr.mxu1 %v2905_v0 }
 0x8a0   :  { %2434 = vmatpush3.msra.mxu1 %v3035_v9 }
 0x8a1   :  { %2435 = vmatprep.subr.mxu1 %v2905_v0 }
 0x8a2   :  { %2436 = vmatpush3.msra.mxu1 %v3040_v12 }
 0x8a3   :  { %2451 = vmatprep.subr.mxu1 %v2905_v0 }
 0x95b   :  { %v862_v16 = vpop.f32.mrf.mxu1 }
 0x95c   :  { %v867_v17 = vrot.slane %v862_v16, 5  ;;  %v868_v18 = vrot.slane %v862_v16, 6 }
 0x95d   :  { %v2417_v19 = vpop.f32.mrf.mxu1 }
 0x95e   :  { %v871_v21 = vadd.f32 %v867_v17, %v3075_v25  ;;  %v872_v22 = vadd.f32 %v868_v18, %v3072_v20 }
 0x960   :  { %2590 = vtanh.f32 %v871_v21  ;;  %v2253_v26 = vmul.f32 -1.442695, %v871_v21  ;;  %v2254_v27 = vmul.f32 -1.442695, %v872_v22 }
 0x961   :  { %2592 = vtanh.f32 %v872_v22 }
 0x962   :  { %2594 = vpow2.f32 %v2253_v26 }
 0x963   :  { %2596 = vpow2.f32 %v2254_v27 }
 0x96d   :  { %v2591_v23 = vpop.eup %2590 }
 0x96e   :  { %v2593_v24 = vpop.eup %2592  ;;  %897 = vrot.lane.b32.xlu1 %v2591_v23, %s2907_s22 }
 0x96f   :  { %899 = vrot.lane.b32.xlu0 %v2593_v24, %s2907_s22  ;;  %v2595_v28 = vpop.eup %2594 }
 0x970   :  { %v2597_v29 = vpop.eup %2596  ;;  %v879_v32 = vadd.f32 1.0, %v2595_v28 }
 0x971   :  { %v880_v33 = vadd.f32 1.0, %v2597_v29 }
 0x972   :  { %2598 = vrcp.f32 %v879_v32 }
 0x973   :  { %2600 = vrcp.f32 %v880_v33 }
 0x97f   :  { %v2599_v34 = vpop.eup %2598 }
 0x980   :  { %v2601_v36 = vpop.eup %2600  ;;  %v893_v42 = vmul.f32 %v2599_v34, %v889_v40 }
 0x981   :  { %v894_v43 = vmul.f32 %v2601_v36, %v890_v41 }
 0x9e0   :  { %v898_v35 = vpop.permute.xlu1 %897 }
 0x9e1   :  { %v900_v37 = vpop.permute.xlu0 %899  ;;  %v903_v38 = vmul.f32 %v2599_v34, %v898_v35 }
 0x9e2   :  { %v904_v39 = vmul.f32 %v2601_v36, %v900_v37 }
 0x9e3   :  { %907 = vrot.lane.b32.xlu1 %v903_v38, %s2908_s4 }
 0x9e4   :  { %909 = vrot.lane.b32.xlu0 %v904_v39, %s2908_s4 }
 0xa55   :  { %v908_v44 = vpop.permute.xlu1 %907 }
 0xa56   :  { %v910_v45 = vpop.permute.xlu0 %909  ;;  %v913_v46 = vadd.f32 %v908_v44, %v893_v42 }
 0xa57   :  { %v914_v47 = vadd.f32 %v910_v45, %v894_v43 }
 0xa58   :  { %2602 = vtanh.f32 %v913_v46  ;;  %v1041_v24 = vrot.slane %v913_v46, 7 }
 0xa59   :  { %2604 = vtanh.f32 %v914_v47  ;;  %v1042_v26 = vrot.slane %v914_v47, 7 }
 0xa65   :  { %v2603_v48 = vpop.eup %2602 }
 0xa66   :  { %v2605_v49 = vpop.eup %2604  ;;  %919 = vrot.lane.b32.xlu1 %v2603_v48, %s2907_s22 }
 0xa67   :  { %921 = vrot.lane.b32.xlu0 %v2605_v49, %s2907_s22 }
 0xad8   :  { %v920_v51 = vpop.permute.xlu1 %919 }
 0xad9   :  { %v922_v52 = vpop.permute.xlu0 %921  ;;  %v3165_v54 = vmul.f32 %v2599_v34, %v920_v51 }
 0xada   :  { %v3167_v55 = vmul.f32 %v2601_v36, %v922_v52 }
 0xadb   :  { %v941_v56 = vrot.slane %v3165_v54, 3 }
 0xadc   :  { %v942_v57 = vrot.slane %v3167_v55, 2 }
 0xade   :  { %v943_v58 = vsel %vm488_vm2, %v942_v57, %v941_v56 }
 0xadf   :  { %944 = vrot.lane.b32.xlu1 %v943_v58, %s2908_s4 }
 0xb51   :  { %v945_v59 = vpop.permute.xlu1 %944 }
 0xb52   :  { %2427 = vmatmul.mubr.msk.f32.vlgmr.msra.gmra.mxu0 %vm345_vm3, %v945_v59 }
 0xb53   :  { %2441 = vmatpush3.msra.mxu0 %v3027_v3  ;;  %2448 = vmatprep.mubr.msk.f32.mxu0 %vm2906_vm0, %v2905_v0 }
 0xb54   :  { %2442 = vmatprep.subr.mxu0 %v2905_v0 }
 0xb55   :  { %2443 = vmatpush3.msra.mxu0 %v3031_v7 }
 0xb56   :  { %2444 = vmatprep.subr.mxu0 %v2905_v0 }
 0xb57   :  { %2445 = vmatpush3.msra.mxu0 %v3035_v9 }
 0xb58   :  { %2446 = vmatprep.subr.mxu0 %v2905_v0 }
 0xb59   :  { %2447 = vmatpush3.msra.mxu0 %v3040_v12 }
 0xc12   :  { %v1014_v60 = vpop.f32.mrf.mxu0 }
 0xc13   :  { %v1019_v61 = vrot.slane %v1014_v60, 4  ;;  %v1020_v62 = vrot.slane %v1014_v60, 5 }
 0xc14   :  { %v2428_v63 = vpop.f32.mrf.mxu0 }
 0xc15   :  { %v1023_v1 = vadd.f32 %v1019_v61, %v3075_v25  ;;  %v1024_v2 = vadd.f32 %v1020_v62, %v3072_v20 }
 0xc17   :  { %2606 = vtanh.f32 %v1023_v1  ;;  %v2256_v6 = vmul.f32 -1.442695, %v1023_v1  ;;  %v2257_v11 = vmul.f32 -1.442695, %v1024_v2 }
 0xc18   :  { %2608 = vtanh.f32 %v1024_v2 }
 0xc19   :  { %2610 = vpow2.f32 %v2256_v6 }
 0xc1a   :  { %2612 = vpow2.f32 %v2257_v11 }
 0xc24   :  { %v2607_v4 = vpop.eup %2606 }
 0xc25   :  { %v2609_v5 = vpop.eup %2608  ;;  %1049 = vrot.lane.b32.xlu0 %v2607_v4, %s2907_s22 }
 0xc26   :  { %1051 = vrot.lane.b32.xlu1 %v2609_v5, %s2907_s22  ;;  %v2611_v13 = vpop.eup %2610 }
 0xc27   :  { %v2613_v14 = vpop.eup %2612  ;;  %v1031_v15 = vadd.f32 1.0, %v2611_v13 }
 0xc28   :  { %v1032_v16 = vadd.f32 1.0, %v2613_v14 }
 0xc29   :  { %2614 = vrcp.f32 %v1031_v15 }
 0xc2a   :  { %2616 = vrcp.f32 %v1032_v16 }
 0xc36   :  { %v2615_v17 = vpop.eup %2614 }
 0xc37   :  { %v2617_v19 = vpop.eup %2616  ;;  %v1045_v27 = vmul.f32 %v2615_v17, %v1041_v24 }
 0xc38   :  { %v1046_v28 = vmul.f32 %v2617_v19, %v1042_v26 }
 0xc97   :  { %v1050_v18 = vpop.permute.xlu0 %1049 }
 0xc98   :  { %v1052_v21 = vpop.permute.xlu1 %1051  ;;  %v1055_v22 = vmul.f32 %v2615_v17, %v1050_v18 }
 0xc99   :  { %v1056_v23 = vmul.f32 %v2617_v19, %v1052_v21 }
 0xc9a   :  { %1059 = vrot.lane.b32.xlu0 %v1055_v22, %s2908_s4 }
 0xc9b   :  { %1061 = vrot.lane.b32.xlu1 %v1056_v23, %s2908_s4 }
 0xd0c   :  { %v1060_v29 = vpop.permute.xlu0 %1059 }
 0xd0d   :  { %v1062_v32 = vpop.permute.xlu1 %1061  ;;  %v1065_v33 = vadd.f32 %v1060_v29, %v1045_v27 }
 0xd0e   :  { %v1066_v34 = vadd.f32 %v1062_v32, %v1046_v28 }
 0xd0f   :  { %2618 = vtanh.f32 %v1065_v33  ;;  %v1193_v2 = vrot.slane %v1065_v33, 7 }
 0xd10   :  { %2620 = vtanh.f32 %v1066_v34  ;;  %v1194_v4 = vrot.slane %v1066_v34, 7 }
 0xd1c   :  { %v2619_v35 = vpop.eup %2618 }
 0xd1d   :  { %v2621_v36 = vpop.eup %2620  ;;  %1071 = vrot.lane.b32.xlu0 %v2619_v35, %s2907_s22 }
 0xd1e   :  { %1073 = vrot.lane.b32.xlu1 %v2621_v36, %s2907_s22 }
 0xd8f   :  { %v1072_v37 = vpop.permute.xlu0 %1071 }
 0xd90   :  { %v1074_v38 = vpop.permute.xlu1 %1073  ;;  %v3191_v39 = vmul.f32 %v2615_v17, %v1072_v37 }
 0xd91   :  { %v3193_v40 = vmul.f32 %v2617_v19, %v1074_v38 }
 0xd92   :  { %v1093_v41 = vrot.slane %v3191_v39, 4 }
 0xd93   :  { %v1094_v42 = vrot.slane %v3193_v40, 3 }
 0xd95   :  { %v1095_v43 = vsel %vm488_vm2, %v1094_v42, %v1093_v41 }
 0xd96   :  { %1096 = vrot.lane.b32.xlu0 %v1095_v43, %s2908_s4 }
 0xe08   :  { %v1097_v44 = vpop.permute.xlu0 %1096 }
 0xe09   :  { %2438 = vmatmul.mubr.msk.f32.vlgmr.msra.gmra.mxu1 %vm345_vm3, %v1097_v44 }
 0xe0a   :  { %2452 = vmatpush3.msra.mxu1 %v3027_v3  ;;  %2459 = vmatprep.mubr.msk.f32.mxu1 %vm2906_vm0, %v2905_v0 }
 0xe0b   :  { %2453 = vmatprep.subr.mxu1 %v2905_v0 }
 0xe0c   :  { %2454 = vmatpush3.msra.mxu1 %v3031_v7 }
 0xe0d   :  { %2455 = vmatprep.subr.mxu1 %v2905_v0 }
 0xe0e   :  { %2456 = vmatpush3.msra.mxu1 %v3035_v9 }
 0xe0f   :  { %2457 = vmatprep.subr.mxu1 %v2905_v0 }
 0xe10   :  { %2458 = vmatpush3.msra.mxu1 %v3040_v12 }
 0xe11   :  { %2473 = vmatprep.subr.mxu1 %v2905_v0 }
 0xec9   :  { %v1166_v45 = vpop.f32.mrf.mxu1 }
 0xeca   :  { %v1171_v46 = vrot.slane %v1166_v45, 3  ;;  %v1172_v3 = vrot.slane %v1166_v45, 4 }
 0xecb   :  { %v2439_v47 = vpop.f32.mrf.mxu1 }
 0xecc   :  { %v1175_v48 = vadd.f32 %v1171_v46, %v3075_v25  ;;  %v1176_v49 = vadd.f32 %v1172_v3, %v3072_v20 }
 0xece   :  { %2622 = vtanh.f32 %v1175_v48  ;;  %v2259_v9 = vmul.f32 -1.442695, %v1175_v48  ;;  %v2260_v12 = vmul.f32 -1.442695, %v1176_v49 }
 0xecf   :  { %2624 = vtanh.f32 %v1176_v49 }
 0xed0   :  { %2626 = vpow2.f32 %v2259_v9 }
 0xed1   :  { %2628 = vpow2.f32 %v2260_v12 }
 0xedb   :  { %v2623_v7 = vpop.eup %2622 }
 0xedc   :  { %v2625_v51 = vpop.eup %2624  ;;  %1201 = vrot.lane.b32.xlu1 %v2623_v7, %s2907_s22 }
 0xedd   :  { %1203 = vrot.lane.b32.xlu0 %v2625_v51, %s2907_s22  ;;  %v2627_v52 = vpop.eup %2626 }
 0xede   :  { %v2629_v56 = vpop.eup %2628  ;;  %v1183_v57 = vadd.f32 1.0, %v2627_v52 }
 0xedf   :  { %v1184_v58 = vadd.f32 1.0, %v2629_v56 }
 0xee0   :  { %2630 = vrcp.f32 %v1183_v57 }
 0xee1   :  { %2632 = vrcp.f32 %v1184_v58 }
 0xeed   :  { %v2631_v59 = vpop.eup %2630 }
 0xeee   :  { %v2633_v61 = vpop.eup %2632  ;;  %v1197_v5 = vmul.f32 %v2631_v59, %v1193_v2 }
 0xeef   :  { %v1198_v6 = vmul.f32 %v2633_v61, %v1194_v4 }
 0xf4e   :  { %v1202_v60 = vpop.permute.xlu1 %1201 }
 0xf4f   :  { %v1204_v62 = vpop.permute.xlu0 %1203  ;;  %v1207_v63 = vmul.f32 %v2631_v59, %v1202_v60 }
 0xf50   :  { %v1208_v1 = vmul.f32 %v2633_v61, %v1204_v62 }
 0xf51   :  { %1211 = vrot.lane.b32.xlu1 %v1207_v63, %s2908_s4 }
 0xf52   :  { %1213 = vrot.lane.b32.xlu0 %v1208_v1, %s2908_s4 }
 0xfc3   :  { %v1212_v11 = vpop.permute.xlu1 %1211 }
 0xfc4   :  { %v1214_v13 = vpop.permute.xlu0 %1213  ;;  %v1217_v14 = vadd.f32 %v1212_v11, %v1197_v5 }
 0xfc5   :  { %v1218_v15 = vadd.f32 %v1214_v13, %v1198_v6 }
 0xfc6   :  { %2634 = vtanh.f32 %v1217_v14  ;;  %v1345_v51 = vrot.slane %v1217_v14, 7 }
 0xfc7   :  { %2636 = vtanh.f32 %v1218_v15  ;;  %v1346_v9 = vrot.slane %v1218_v15, 7 }
 0xfd3   :  { %v2635_v16 = vpop.eup %2634 }
 0xfd4   :  { %v2637_v17 = vpop.eup %2636  ;;  %1223 = vrot.lane.b32.xlu1 %v2635_v16, %s2907_s22 }
 0xfd5   :  { %1225 = vrot.lane.b32.xlu0 %v2637_v17, %s2907_s22 }
0x1046   :  { %v1224_v18 = vpop.permute.xlu1 %1223 }
0x1047   :  { %v1226_v19 = vpop.permute.xlu0 %1225  ;;  %v3218_v21 = vmul.f32 %v2631_v59, %v1224_v18 }
0x1048   :  { %v3220_v22 = vmul.f32 %v2633_v61, %v1226_v19 }
0x1049   :  { %v1245_v23 = vrot.slane %v3218_v21, 5 }
0x104a   :  { %v1246_v24 = vrot.slane %v3220_v22, 4 }
0x104c   :  { %v1247_v26 = vsel %vm488_vm2, %v1246_v24, %v1245_v23 }
0x104d   :  { %1248 = vrot.lane.b32.xlu1 %v1247_v26, %s2908_s4 }
0x10bf   :  { %v1249_v27 = vpop.permute.xlu1 %1248 }
0x10c0   :  { %2449 = vmatmul.mubr.msk.f32.vlgmr.msra.gmra.mxu0 %vm345_vm3, %v1249_v27 }
0x1180   :  { %v1318_v28 = vpop.f32.mrf.mxu0 }
0x1181   :  { %v1323_v29 = vrot.slane %v1318_v28, 2  ;;  %v1324_v32 = vrot.slane %v1318_v28, 3 }
0x1182   :  { %v2450_v33 = vpop.f32.mrf.mxu0 }
0x1183   :  { %v1327_v34 = vadd.f32 %v1323_v29, %v3075_v25  ;;  %v1328_v35 = vadd.f32 %v1324_v32, %v3072_v20 }
0x1185   :  { %2638 = vtanh.f32 %v1327_v34  ;;  %v2262_v38 = vmul.f32 -1.442695, %v1327_v34  ;;  %v2263_v41 = vmul.f32 -1.442695, %v1328_v35 }
0x1186   :  { %2640 = vtanh.f32 %v1328_v35 }
0x1187   :  { %2642 = vpow2.f32 %v2262_v38 }
0x1188   :  { %2644 = vpow2.f32 %v2263_v41 }
0x1192   :  { %v2639_v36 = vpop.eup %2638 }
0x1193   :  { %v2641_v37 = vpop.eup %2640  ;;  %1353 = vrot.lane.b32.xlu0 %v2639_v36, %s2907_s22 }
0x1194   :  { %1355 = vrot.lane.b32.xlu1 %v2641_v37, %s2907_s22  ;;  %v2643_v42 = vpop.eup %2642 }
0x1195   :  { %v2645_v43 = vpop.eup %2644  ;;  %v1335_v44 = vadd.f32 1.0, %v2643_v42 }
0x1196   :  { %v1336_v45 = vadd.f32 1.0, %v2645_v43 }
0x1197   :  { %2646 = vrcp.f32 %v1335_v44 }
0x1198   :  { %2648 = vrcp.f32 %v1336_v45 }
0x11a4   :  { %v2647_v46 = vpop.eup %2646 }
0x11a5   :  { %v2649_v47 = vpop.eup %2648  ;;  %v1349_v12 = vmul.f32 %v2647_v46, %v1345_v51 }
0x11a6   :  { %v1350_v52 = vmul.f32 %v2649_v47, %v1346_v9 }
0x1205   :  { %v1354_v3 = vpop.permute.xlu0 %1353 }
0x1206   :  { %v1356_v48 = vpop.permute.xlu1 %1355  ;;  %v1359_v49 = vmul.f32 %v2647_v46, %v1354_v3 }
0x1207   :  { %v1360_v7 = vmul.f32 %v2649_v47, %v1356_v48 }
0x1208   :  { %1363 = vrot.lane.b32.xlu0 %v1359_v49, %s2908_s4 }
0x1209   :  { %1365 = vrot.lane.b32.xlu1 %v1360_v7, %s2908_s4 }
0x127a   :  { %v1364_v56 = vpop.permute.xlu0 %1363 }
0x127b   :  { %v1366_v57 = vpop.permute.xlu1 %1365  ;;  %v1369_v58 = vadd.f32 %v1364_v56, %v1349_v12 }
0x127c   :  { %v1370_v59 = vadd.f32 %v1366_v57, %v1350_v52 }
0x127d   :  { %2650 = vtanh.f32 %v1369_v58  ;;  %v1497_v37 = vrot.slane %v1369_v58, 7 }
0x127e   :  { %2652 = vtanh.f32 %v1370_v59  ;;  %v1498_v38 = vrot.slane %v1370_v59, 7 }
0x128a   :  { %v2651_v60 = vpop.eup %2650 }
0x128b   :  { %v2653_v61 = vpop.eup %2652  ;;  %1375 = vrot.lane.b32.xlu0 %v2651_v60, %s2907_s22 }
0x128c   :  { %1377 = vrot.lane.b32.xlu1 %v2653_v61, %s2907_s22 }
0x12fd   :  { %v1376_v62 = vpop.permute.xlu0 %1375 }
0x12fe   :  { %v1378_v63 = vpop.permute.xlu1 %1377  ;;  %v1381_v1 = vmul.f32 %v2647_v46, %v1376_v62 }
0x12ff   :  { %v3235_v2 = vmul.f32 %v2649_v47, %v1378_v63 }
0x1300   :  { %v1397_v4 = vrot.slane %v1381_v1, 6 }
0x1301   :  { %v1398_v5 = vrot.slane %v3235_v2, 5 }
0x1303   :  { %v1399_v6 = vsel %vm488_vm2, %v1398_v5, %v1397_v4 }
0x1304   :  { %1400 = vrot.lane.b32.xlu0 %v1399_v6, %s2908_s4 }
0x1376   :  { %v1401_v11 = vpop.permute.xlu0 %1400 }
0x1377   :  { %2460 = vmatmul.mubr.msk.f32.vlgmr.msra.gmra.mxu1 %vm345_vm3, %v1401_v11 }
0x1378   :  { %2475 = vmatprep.mubr.msk.f32.mxu1 %vm2906_vm0, %v2905_v0 }
0x1437   :  { %v1470_v13 = vpop.f32.mrf.mxu1 }
0x1438   :  { %v1475_v14 = vrot.slane %v1470_v13, 1  ;;  %v1476_v15 = vrot.slane %v1470_v13, 2 }
0x1439   :  { %v2461_v16 = vpop.f32.mrf.mxu1 }
0x143a   :  { %v1479_v17 = vadd.f32 %v1475_v14, %v3075_v25  ;;  %v1480_v18 = vadd.f32 %v1476_v15, %v3072_v20 }
0x143c   :  { %2654 = vtanh.f32 %v1479_v17  ;;  %v2265_v24 = vmul.f32 -1.442695, %v1479_v17  ;;  %v2266_v26 = vmul.f32 -1.442695, %v1480_v18 }
0x143d   :  { %2656 = vtanh.f32 %v1480_v18 }
0x143e   :  { %2658 = vpow2.f32 %v2265_v24 }
0x143f   :  { %2660 = vpow2.f32 %v2266_v26 }
0x1449   :  { %v2655_v19 = vpop.eup %2654 }
0x144a   :  { %v2657_v23 = vpop.eup %2656  ;;  %1505 = vrot.lane.b32.xlu1 %v2655_v19, %s2907_s22 }
0x144b   :  { %1507 = vrot.lane.b32.xlu0 %v2657_v23, %s2907_s22  ;;  %v2659_v27 = vpop.eup %2658 }
0x144c   :  { %v2661_v28 = vpop.eup %2660  ;;  %v1487_v29 = vadd.f32 1.0, %v2659_v27 }
0x144d   :  { %v1488_v32 = vadd.f32 1.0, %v2661_v28  ;;  %v1958_v28 = vld [vmem:[#allocation15 + $0x18] sm:$0xff] }
0x144e   :  { %2662 = vrcp.f32 %v1487_v29  ;;  %v1954_v29 = vld [vmem:[#allocation14 + $0x18] sm:$0xff] }
0x144f   :  { %2664 = vrcp.f32 %v1488_v32 }
0x145b   :  { %v2663_v25 = vpop.eup %2662 }
0x145c   :  { %v2665_v33 = vpop.eup %2664  ;;  %v1501_v41 = vmul.f32 %v2663_v25, %v1497_v37 }
0x145d   :  { %v1502_v42 = vmul.f32 %v2665_v33, %v1498_v38  ;;  %v1955_v38 = vld [vmem:[#allocation15] sm:$0xff] }
0x14bc   :  { %v1506_v20 = vpop.permute.xlu1 %1505 }
0x14bd   :  { %v1508_v34 = vpop.permute.xlu0 %1507  ;;  %v1511_v35 = vmul.f32 %v2663_v25, %v1506_v20 }
0x14be   :  { %v1512_v36 = vmul.f32 %v2665_v33, %v1508_v34  ;;  %v1957_v34 = vld [vmem:[#allocation15 + $0x10] sm:$0xff] }
0x14bf   :  { %1515 = vrot.lane.b32.xlu1 %v1511_v35, %s2908_s4 }
0x14c0   :  { %1517 = vrot.lane.b32.xlu0 %v1512_v36, %s2908_s4  ;;  %v1956_v36 = vld [vmem:[#allocation15 + $0x8] sm:$0xff] }
0x1531   :  { %v1516_v43 = vpop.permute.xlu1 %1515 }
0x1532   :  { %v1518_v44 = vpop.permute.xlu0 %1517  ;;  %v1521_v45 = vadd.f32 %v1516_v43, %v1501_v41  ;;  %v1953_v41 = vld [vmem:[#allocation14 + $0x10] sm:$0xff]  ;;  %v1951_v43 = vld [vmem:[#allocation14] sm:$0xff] }
0x1533   :  { %v1522_v46 = vadd.f32 %v1518_v44, %v1502_v42  ;;  %v1952_v42 = vld [vmem:[#allocation14 + $0x8] sm:$0xff] }
0x1534   :  { %2666 = vtanh.f32 %v1521_v45 }
0x1535   :  { %2668 = vtanh.f32 %v1522_v46 }
0x1541   :  { %v2667_v3 = vpop.eup %2666 }
0x1542   :  { %v2669_v47 = vpop.eup %2668  ;;  %1527 = vrot.lane.b32.xlu1 %v2667_v3, %s2907_s22 }
0x1543   :  { %1529 = vrot.lane.b32.xlu0 %v2669_v47, %s2907_s22  ;;  %v2136_v47 = vld [vmem:[#allocation17 + $0x18] sm:$0xff] }
0x1546   :  { %475 = vrot.lane.b32.xlu1 %v3087_v53, %s2908_s4  ;;  %v1553_v53 = vld [vmem:[#allocation12 + $0x10] sm:$0xff] }
0x1547   :  { %626 = vrot.lane.b32.xlu0 %v3111_v30, %s2908_s4  ;;  %v1552_v30 = vld [vmem:[#allocation12 + $0x8] sm:$0xff] }
0x154a   :  { %777 = vrot.lane.b32.xlu1 %v3138_v8, %s2908_s4 }
0x154b   :  { %929 = vrot.lane.b32.xlu0 %v3165_v54, %s2908_s4 }
0x154e   :  { %477 = vrot.lane.b32.xlu1 %v3084_v50, %s2908_s4  ;;  %v1554_v50 = vld [vmem:[#allocation12 + $0x18] sm:$0xff] }
0x154f   :  { %628 = vrot.lane.b32.xlu0 %v3113_v31, %s2908_s4  ;;  %2462 = vmatprep.subr.mxu0 %v1554_v50  ;;  %v1551_v31 = vld [vmem:[#allocation12] sm:$0xff] }
0x1550   :  { %2463 = vmatpush3.msra.mxu0 %v1554_v50  ;;  %v2135_v50 = vld [vmem:[#allocation17 + $0x10] sm:$0xff] }
0x1551   :  { %2464 = vmatprep.subr.mxu0 %v1553_v53 }
0x1552   :  { %779 = vrot.lane.b32.xlu1 %v3140_v10, %s2908_s4  ;;  %2465 = vmatpush3.msra.mxu0 %v1553_v53  ;;  %v2134_v53 = vld [vmem:[#allocation17 + $0x8] sm:$0xff] }
0x1553   :  { %931 = vrot.lane.b32.xlu0 %v3167_v55, %s2908_s4  ;;  %2466 = vmatprep.subr.mxu0 %v1552_v30 }
0x1554   :  { %2467 = vmatpush3.msra.mxu0 %v1552_v30  ;;  %v2133_v30 = vld [vmem:[#allocation17] sm:$0xff] }
0x1555   :  { %2468 = vmatprep.subr.mxu0 %v1551_v31 }
0x1556   :  { %1081 = vrot.lane.b32.xlu1 %v3191_v39, %s2908_s4  ;;  %2469 = vmatpush3.msra.mxu0 %v1551_v31 }
0x1557   :  { %1233 = vrot.lane.b32.xlu0 %v3218_v21, %s2908_s4  ;;  %2483 = vmatprep.subr.mxu0 %v2905_v0 }
0x155a   :  { %1385 = vrot.lane.b32.xlu1 %v1381_v1, %s2908_s4 }
0x155b   :  { %1235 = vrot.lane.b32.xlu0 %v3220_v22, %s2908_s4 }
0x155e   :  { %1083 = vrot.lane.b32.xlu1 %v3193_v40, %s2908_s4 }
0x1562   :  { %1387 = vrot.lane.b32.xlu1 %v3235_v2, %s2908_s4 }
0x15b4   :  { %v1528_v8 = vpop.permute.xlu1 %1527 }
0x15b5   :  { %v1530_v10 = vpop.permute.xlu0 %1529  ;;  %v1533_v54 = vmul.f32 %v2663_v25, %v1528_v8 }
0x15b6   :  { %v1534_v39 = vmul.f32 %v2665_v33, %v1530_v10 }
0x15b7   :  { %1537 = vrot.lane.b32.xlu0 %v1533_v54, %s2908_s4 }
0x15b8   :  { %v476_v55 = vpop.permute.xlu1 %475 }
0x15b9   :  { %v627_v40 = vpop.permute.xlu0 %626  ;;  %482 = vst.msk [vmem:[#allocation2] sm:$0x1] %vm481_vm4, %v476_v55 }
0x15ba   :  { %485 = vst.msk [vmem:[#allocation2 + $0x7] sm:$0x1] %vm484_vm5, %v476_v55 }
0x15bb   :  { %633 = vst.msk [vmem:[#allocation2] sm:$0x2] %vm632_vm6, %v627_v40  ;;  %1539 = vrot.lane.b32.xlu0 %v1534_v39, %s2908_s4 }
0x15bc   :  { %636 = vst.msk [vmem:[#allocation2 + $0x5] sm:$0x2] %vm635_vm7, %v627_v40  ;;  %v778_v21 = vpop.permute.xlu1 %777 }
0x15bd   :  { %v930_v22 = vpop.permute.xlu0 %929  ;;  %784 = vst.msk [vmem:[#allocation2] sm:$0x4] %vm783_vm8, %v778_v21 }
0x15be   :  { %787 = vst.msk [vmem:[#allocation2 + $0x3] sm:$0x4] %vm786_vm9, %v778_v21 }
0x15bf   :  { %936 = vst.msk [vmem:[#allocation2] sm:$0x8] %vm935_vm10, %v930_v22 }
0x15c0   :  { %939 = vst.msk [vmem:[#allocation2 + $0x1] sm:$0x8] %vm938_vm11, %v930_v22  ;;  %v478_v48 = vpop.permute.xlu1 %477 }
0x15c1   :  { %v629_v49 = vpop.permute.xlu0 %628  ;;  %483 = vst.msk [vmem:[#allocation2 + $0x8] sm:$0x1] %vm481_vm4, %v478_v48  ;;  %vm1394_vm4 = vcmask 260230  }
0x15c2   :  { %486 = vst.msk [vmem:[#allocation2 + $0xf] sm:$0x1] %vm484_vm5, %v478_v48  ;;  %vm1543_vm5 = vcmask 130055  }
0x15c3   :  { %634 = vst.msk [vmem:[#allocation2 + $0x8] sm:$0x2] %vm632_vm6, %v629_v49  ;;  %vm1546_vm6 = vcmask 261255  }
0x15c4   :  { %637 = vst.msk [vmem:[#allocation2 + $0xd] sm:$0x2] %vm635_vm7, %v629_v49  ;;  %v780_v7 = vpop.permute.xlu1 %779  ;;  %vm1782_vm7 = vcmask 64512  }
0x15c5   :  { %v932_v51 = vpop.permute.xlu0 %931  ;;  %785 = vst.msk [vmem:[#allocation2 + $0x8] sm:$0x4] %vm783_vm8, %v780_v7 }
0x15c6   :  { %788 = vst.msk [vmem:[#allocation2 + $0xb] sm:$0x4] %vm786_vm9, %v780_v7 }
0x15c7   :  { %937 = vst.msk [vmem:[#allocation2 + $0x8] sm:$0x8] %vm935_vm10, %v932_v51 }
0x15c8   :  { %940 = vst.msk [vmem:[#allocation2 + $0x9] sm:$0x8] %vm938_vm11, %v932_v51  ;;  %v1082_v9 = vpop.permute.xlu1 %1081 }
0x15c9   :  { %v1234_v12 = vpop.permute.xlu0 %1233  ;;  %1088 = vst.msk [vmem:[#allocation2] sm:$0x10] %vm1087_vm12, %v1082_v9 }
0x15ca   :  { %1091 = vst.msk [vmem:[#allocation2 - $0x1] sm:$0x10] %vm1090_vm13, %v1082_v9 }
0x15cb   :  { %1240 = vst.msk [vmem:[#allocation2] sm:$0x20] %vm1239_vm14, %v1234_v12 }
0x15cc   :  { %1243 = vst.msk [vmem:[#allocation2 - $0x3] sm:$0x20] %vm1242_vm15, %v1234_v12  ;;  %v1386_v52 = vpop.permute.xlu1 %1385 }
0x15cd   :  { %v1236_v56 = vpop.permute.xlu0 %1235  ;;  %1392 = vst.msk [vmem:[#allocation2] sm:$0x40] %vm1391_vm1, %v1386_v52 }
0x15ce   :  { %1395 = vst.msk [vmem:[#allocation2 - $0x5] sm:$0x40] %vm1394_vm4, %v1386_v52 }
0x15cf   :  { %1241 = vst.msk [vmem:[#allocation2 + $0x8] sm:$0x20] %vm1239_vm14, %v1236_v56 }
0x15d0   :  { %1244 = vst.msk [vmem:[#allocation2 + $0x5] sm:$0x20] %vm1242_vm15, %v1236_v56  ;;  %v1084_v57 = vpop.permute.xlu1 %1083 }
0x15d1   :  { %1089 = vst.msk [vmem:[#allocation2 + $0x8] sm:$0x10] %vm1087_vm12, %v1084_v57 }
0x15d2   :  { %1092 = vst.msk [vmem:[#allocation2 + $0x7] sm:$0x10] %vm1090_vm13, %v1084_v57 }
0x15d4   :  { %v1388_v58 = vpop.permute.xlu1 %1387 }
0x15d5   :  { %1393 = vst.msk [vmem:[#allocation2 + $0x8] sm:$0x40] %vm1391_vm1, %v1388_v58 }
0x15d6   :  { %1396 = vst.msk [vmem:[#allocation2 + $0x3] sm:$0x40] %vm1394_vm4, %v1388_v58 }
0x1629   :  { %v1538_v59 = vpop.permute.xlu0 %1537 }
0x162a   :  { %1544 = vst.msk [vmem:[#allocation2] sm:$0x80] %vm1543_vm5, %v1538_v59 }
0x162b   :  { %1547 = vst.msk [vmem:[#allocation2 - $0x7] sm:$0x80] %vm1546_vm6, %v1538_v59 }
0x162d   :  { %v1540_v60 = vpop.permute.xlu0 %1539 }
0x162e   :  { %1545 = vst.msk [vmem:[#allocation2 + $0x8] sm:$0x80] %vm1543_vm5, %v1540_v60 }
0x162f   :  { %1548 = vst.msk [vmem:[#allocation2 + $0x1] sm:$0x80] %vm1546_vm6, %v1540_v60 }
0x1632   :  { %v1549_v61 = vld [vmem:[#allocation2] sm:$0xff] }
0x1633   :  { %2470 = vmatprep.mubr.msk.f32.mxu0 %vm345_vm3, %v1549_v61  ;;  %2474 = vmatpush3.xpose.msk.msra.mxu1 %vm345_vm3, %v1549_v61 }
0x1634   :  { %2478 = vmatprep.subr.mxu1 %v2905_v0 }
0x1636   :  { %v1550_v62 = vld [vmem:[#allocation2 + $0x8] sm:$0xff] }
0x1637   :  { %2471 = vmatmul.mubr.msk.f32.vlgmr.msra.gmra.mxu0 %vm345_vm3, %v1550_v62 }
0x1638   :  { %2484 = vmatpush3.msra.mxu0 %v1549_v61  ;;  %2485 = vmatprep.mubr.msk.f32.mxu0 %vm2906_vm0, %v2905_v0 }
0x1639   :  { %2493 = vmatprep.subr.mxu0 %v1958_v28 }
0x16f7   :  { %v2472_v63 = vpop.f32.mrf.mxu0 }
0x16f9   :  { %v1627_v1 = vpop.f32.mrf.mxu0 }
0x16fa   :  { %2476 = vmatmul.mubr.msk.f32.vlgmr.msra.gmra.mxu1 %vm345_vm3, %v1627_v1 }
0x16fb   :  { %2479 = vmatpush3.xpose.msk.msra.mxu1 %vm345_vm3, %v1550_v62  ;;  %2480 = vmatprep.mubr.msk.f32.mxu1 %vm2906_vm0, %v2905_v0 }
0x16fc   :  { %2488 = vmatprep.subr.mxu1 %v2905_v0 }
0x16fe   :  { %2481 = vmatmul.mubr.msk.f32.vlgmr.msra.gmra.mxu1 %vm345_vm3, %v2472_v63 }
0x16ff   :  { %2489 = vmatpush3.msra.mxu1 %v1550_v62  ;;  %2490 = vmatprep.mubr.msk.f32.mxu1 %vm2906_vm0, %v2905_v0 }
0x1700   :  { %2504 = vmatprep.subr.mxu1 %v1954_v29 }
0x17ba   :  { %v1705_v2 = vpop.f32.mrf.mxu1 }
0x17bb   :  { %v1783_v4 = vsel %vm1782_vm7, %v1705_v2, -inf }
0x17bc   :  { %1784 = vmax.xlane.f32.xlu1 %v1783_v4  ;;  %v2477_v5 = vpop.f32.mrf.mxu1 }
0x17be   :  { %v1778_v6 = vpop.f32.mrf.mxu1 }
0x17bf   :  { %v1786_v11 = vsel %vm1782_vm7, %v1778_v6, -inf }
0x17c0   :  { %1787 = vmax.xlane.f32.xlu0 %v1786_v11  ;;  %v2482_v13 = vpop.f32.mrf.mxu1 }
0x1845   :  { %v1785_v14 = vpop.xlane.xlu1 %1784 }
0x1846   :  { %v1789_v15 = vsub.f32 %v1705_v2, %v1785_v14 }
0x1848   :  { %v1791_v16 = vmul.f32 1.442695, %v1789_v15 }
0x1849   :  { %v1788_v17 = vpop.xlane.xlu0 %1787 }
0x184a   :  { %2670 = vpow2.f32 %v1791_v16  ;;  %v1790_v18 = vsub.f32 %v1778_v6, %v1788_v17 }
0x184c   :  { %v1793_v19 = vmul.f32 1.442695, %v1790_v18 }
0x184e   :  { %2672 = vpow2.f32 %v1793_v19 }
0x1857   :  { %v2671_v23 = vpop.eup %2670 }
0x1858   :  { %v1795_v24 = vsel %vm1782_vm7, %v2671_v23, 0.0 }
0x1859   :  { %1796 = vadd.xlane.f32.xlu0 %v1795_v24 }
0x185b   :  { %v2673_v26 = vpop.eup %2672 }
0x185c   :  { %v1798_v27 = vsel %vm1782_vm7, %v2673_v26, 0.0 }
0x185d   :  { %1799 = vadd.xlane.f32.xlu1 %v1798_v27 }
0x18e2   :  { %v1797_v32 = vpop.xlane.xlu0 %1796 }
0x18e3   :  { %2674 = vrcp.f32 %v1797_v32 }
0x18e6   :  { %v1800_v25 = vpop.xlane.xlu1 %1799 }
0x18e7   :  { %2676 = vrcp.f32 %v1800_v25 }
0x18f0   :  { %v2675_v20 = vpop.eup %2674 }
0x18f1   :  { %v1803_v33 = vmul.f32 %v2675_v20, %v2671_v23 }
0x18f3   :  { %2486 = vmatmul.mubr.msk.f32.vlgmr.msra.gmra.mxu0 %vm1782_vm7, %v1803_v33 }
0x18f4   :  { %v2677_v35 = vpop.eup %2676  ;;  %2494 = vmatpush3.msra.mxu0 %v1958_v28  ;;  %2501 = vmatprep.mubr.msk.f32.mxu0 %vm345_vm3, %v1627_v1  ;;  %v2279_v1 = vld [vmem:[%s3351_s10] ss:$0 sm:$0xff] }
0x18f5   :  { %2495 = vmatprep.subr.mxu0 %v1957_v34  ;;  %v1804_v37 = vmul.f32 %v2677_v35, %v2673_v26 }
0x18f6   :  { %2496 = vmatpush3.msra.mxu0 %v1957_v34 }
0x18f7   :  { %2497 = vmatprep.subr.mxu0 %v1956_v36  ;;  %2491 = vmatmul.mubr.msk.f32.vlgmr.msra.gmra.mxu1 %vm1782_vm7, %v1804_v37 }
0x18f8   :  { %2498 = vmatpush3.msra.mxu0 %v1956_v36  ;;  %2505 = vmatpush3.msra.mxu1 %v1954_v29 }
0x18f9   :  { %2499 = vmatprep.subr.mxu0 %v1955_v38  ;;  %2506 = vmatprep.subr.mxu1 %v1953_v41 }
0x18fa   :  { %2500 = vmatpush3.msra.mxu0 %v1955_v38  ;;  %2507 = vmatpush3.msra.mxu1 %v1953_v41 }
0x18fb   :  { %2502 = vmatmul.mubr.msk.f32.vlgmr.msra.gmra.mxu0 %vm345_vm3, %v2472_v63  ;;  %2515 = vmatprep.subr.mxu0 %v2905_v0 }
0x18fc   :  { %2523 = vmatprep.mubr.msk.f32.mxu0 %vm2906_vm0, %v2905_v0  ;;  %2508 = vmatprep.subr.mxu1 %v1952_v42 }
0x18fd   :  { %2509 = vmatpush3.msra.mxu1 %v1952_v42  ;;  %2516 = vmatpush3.msra.mxu0 %v2136_v47 }
0x18fe   :  { %2510 = vmatprep.subr.mxu1 %v1951_v43  ;;  %2517 = vmatprep.subr.mxu0 %v2905_v0 }
0x18ff   :  { %2511 = vmatpush3.msra.mxu1 %v1951_v43  ;;  %2518 = vmatpush3.msra.mxu0 %v2135_v50 }
0x1900   :  { %2519 = vmatprep.subr.mxu0 %v2905_v0 }
0x1901   :  { %2520 = vmatpush3.msra.mxu0 %v2134_v53 }
0x1902   :  { %2521 = vmatprep.subr.mxu0 %v2905_v0 }
0x1903   :  { %2522 = vmatpush3.msra.mxu0 %v2133_v30 }
0x19b3   :  { %v1874_v44 = vpop.f32.mrf.mxu0 }
0x19b4   :  { %2512 = vmatprep.mubr.msk.f32.mxu1 %vm345_vm3, %v1874_v44 }
0x19b5   :  { %v2487_v45 = vpop.f32.mrf.mxu0 }
0x19b7   :  { %v1947_v46 = vpop.f32.mrf.mxu1 }
0x19b8   :  { %2513 = vmatmul.mubr.msk.f32.vlgmr.msra.gmra.mxu1 %vm345_vm3, %v1947_v46 }
0x19b9   :  { %v2492_v3 = vpop.f32.mrf.mxu1 }
0x19bb   :  { %v2503_v31 = vpop.f32.mrf.mxu0 }
0x19bd   :  { %v2025_v54 = vpop.f32.mrf.mxu0 }
0x1a78   :  { %v2514_v8 = vpop.f32.mrf.mxu1 }
0x1a79   :  { %v2112_v10 = vadd.f32 %v2514_v8, %v2503_v31 }
0x1a7a   :  { %v2106_v55 = vpop.f32.mrf.mxu1 }
0x1a7b   :  { %2678 = vtanh.f32 %v2112_v10  ;;  %v2107_v39 = vadd.f32 %v2106_v55, %v2025_v54 }
0x1a7d   :  { %2680 = vtanh.f32 %v2107_v39 }
0x1a88   :  { %v2679_v40 = vpop.eup %2678 }
0x1a89   :  { %v2124_v21 = vsel %vm345_vm3, %v2679_v40, 0.0 }
0x1a8a   :  { %v2681_v22 = vpop.eup %2680  ;;  %v2125_v48 = vrot.slane %v2124_v21, 4 }
0x1a8b   :  { %v2117_v49 = vsel %vm345_vm3, %v2681_v22, 0.0 }
0x1a8c   :  { %v2118_v7 = vrot.slane %v2117_v49, 4  ;;  %v2126_v51 = vadd.f32 %v2125_v48, %v2124_v21 }
0x1a8e   :  { %v2119_v9 = vadd.f32 %v2118_v7, %v2117_v49  ;;  %v2127_v0 = vrot.slane %v2126_v51, 2 }
0x1a90   :  { %v2120_v12 = vrot.slane %v2119_v9, 2  ;;  %v2128_v52 = vadd.f32 %v2127_v0, %v2126_v51 }
0x1a92   :  { %v2121_v56 = vadd.f32 %v2120_v12, %v2119_v9  ;;  %v2129_v57 = vrot.slane %v2128_v52, 1 }
0x1a94   :  { %v2122_v58 = vrot.slane %v2121_v56, 1  ;;  %v2130_v59 = vadd.f32 %v2129_v57, %v2128_v52 }
0x1a96   :  { %v2123_v60 = vadd.f32 %v2122_v58, %v2121_v56  ;;  %v2132_v62 = vmax.f32 %v2130_v59, 0.0 }
0x1a98   :  { %v2131_v61 = vmax.f32 %v2123_v60, 0.0 }
0x1a9a   :  { %v2146_v63 = vsel %vm488_vm2, %v2132_v62, %v2131_v61 }
0x1a9b   :  { %2524 = vmatmul.mubr.msk.f32.vlgmr.msra.gmra.mxu0 %vm345_vm3, %v2146_v63 }
0x1b5b   :  { %v2215_v2 = vpop.f32.mrf.mxu0 }
0x1b5c   :  { %v2216_v4 = vadd.f32 %v2279_v1, %v2215_v2 }
0x1b5d   :  { %v2525_v5 = vpop.f32.mrf.mxu0 }
0x1b5e   :  { %2219 = vst [vmem:[#allocation18] sm:$0x3] %v2216_v4 }
0x1b5f   :  { %2873 = shalt.err (!%p2870_p7)
}
0x1b60   :  { %2229 = dma.vmem_to_hbm [thread:$0]  %s2227_s21, 32, %s3352_s11, [#allocation5]  }
0x1b61   :  { %2892 = dma.done.wait [#allocation5], 32  }
0x1b62   :  { %2893 = vsyncadd [#allocation5], 4294967264 }
0x1b63   :  { %2233 = vsyncpa [#allocation4], 1 }
0x1b64   :  { %2234 = vsyncpa [#allocation7], 1 }
0x1b65   :  { %2235 = vsyncpa [#allocation10], 1 }
0x1b66   :  { %2236 = vsyncpa [#allocation13], 1 }
0x1b67   :  { %2237 = vsyncpa [#allocation16], 1 }
0x1b68   :  { %2238 = vsyncpa [#allocation5], 1 }

</bundles_post_ra>
